<compile_context>
chip_gen: v5e
topology: v5e:2x2
jax: 0.10.0
libtpu: 0.0.40
codegen_flags: <defaults>
</compile_context>

<pallas_src>
import functools
import math

import jax
import jax.numpy as jnp
import numpy as np
from jax import lax
from jax.experimental import pallas as pl
from jax.experimental.pallas import tpu as pltpu

NEG_MASK = -1e30  # finite stand-in for -inf


def _layernorm(x, g, b, eps=1e-5):
    mu = jnp.mean(x, axis=-1, keepdims=True)
    var = jnp.mean((x - mu) ** 2, axis=-1, keepdims=True)
    return (x - mu) * lax.rsqrt(var + eps) * g + b


def _bf16_dot(a, w_bf16, b=None):
    """a(f32) @ w(bf16) with f32 accumulation; optional f32 bias."""
    y = jnp.dot(a.astype(jnp.bfloat16), w_bf16, preferred_element_type=jnp.float32)
    if b is not None:
        y = y + b
    return y


def _round_up(x, m):
    return ((x + m - 1) // m) * m


# --------------------------- fused Pallas kernel ----------------------------

def _fused_layer_kernel(x_ref, mask_ref,
                        w_in_ref, b_in_ref,
                        w_qkv_ref, b_qkv_ref, w_o_ref, b_o_ref,
                        ln1_g_ref, ln1_b_ref,
                        w1_ref, b1_ref, w2_ref, b2_ref,
                        ln2_g_ref, ln2_b_ref,
                        w_dec_ref, b_dec_ref,
                        out_ref, attn_ref,
                        x_sc,
                        *, nhead, S, D):
    """One grid step = (one batch block, one encoder layer)."""
    l = pl.program_id(1)

    # Input projection only on the first layer step of this batch block; the
    # activation then stays resident in VMEM scratch across the layer axis.
    @pl.when(l == 0)
    def _():
        x_sc[...] = _bf16_dot(x_ref[...], w_in_ref[...], b_in_ref[...])

    x = x_sc[...]                                   # (S, D) f32
    mask = mask_ref[0]                              # (1, S) additive f32

    # ---- self-attention: head-batched QKV projection --------------------
    # Q/K/V heads live along a LEADING batch axis (3*nhead), so splitting them
    # is a free major-axis slice (no lane shuffles); 1/sqrt(hd) is pre-folded
    # into the Q weights/biases wrapper-side.
    x_b = jnp.broadcast_to(x.astype(jnp.bfloat16)[None], (3 * nhead, S, D))
    qkv = jnp.einsum("hsd,hdf->hsf", x_b, w_qkv_ref[0],
                     preferred_element_type=jnp.float32) + b_qkv_ref[0]
    q = qkv[0:nhead]                                # (nhead, S, hd)
    k = qkv[nhead:2 * nhead]
    v = qkv[2 * nhead:]

    # All heads at once: one score einsum + one context einsum per layer.
    s = jnp.einsum("hqd,hkd->hqk", q.astype(jnp.bfloat16), k.astype(jnp.bfloat16),
                   preferred_element_type=jnp.float32)
    s = s + mask                                    # mask broadcast over keys
    s = s - jnp.max(s, axis=-1, keepdims=True)
    e = jnp.exp(s)
    p = e / jnp.sum(e, axis=-1, keepdims=True)      # exact: rows sum to 1
    attn_ref[...] = jnp.mean(p, axis=0)[None, None]  # head-averaged weights

    ctx = jnp.einsum("hqk,hkd->hqd", p.astype(jnp.bfloat16), v.astype(jnp.bfloat16),
                     preferred_element_type=jnp.float32)        # (nhead, S, hd)
    # per-head output projection, summed over heads == concat(ctx) @ W_o
    sa = jnp.sum(jnp.einsum("hqd,hdf->hqf", ctx.astype(jnp.bfloat16), w_o_ref[0],
                            preferred_element_type=jnp.float32), axis=0)
    sa = sa + b_o_ref[0]

    # dropout1 / dropout2 are identity (eval). Post-norm residual blocks.
    h1 = _layernorm(x + sa, ln1_g_ref[0], ln1_b_ref[0])
    ff = jnp.maximum(_bf16_dot(h1, w1_ref[0], b1_ref[0]), 0.0)
    ff = _bf16_dot(ff, w2_ref[0], b2_ref[0])
    x_new = _layernorm(h1 + ff, ln2_g_ref[0], ln2_b_ref[0])
    x_sc[...] = x_new

    # Decoder on the last layer step (lane-dense padded output).
    @pl.when(l == pl.num_programs(1) - 1)
    def _():
        out_ref[...] = _bf16_dot(x_new, w_dec_ref[...], b_dec_ref[...])


# --------------------------- wrapper -----------------------------------------

def transformer_regressor(inp, padding_mask, params, nhead):
    B, S, Din = inp.shape
    L = len(params["layers"])
    D = params["w_in_t"].shape[1]
    Dout = params["w_dec_t"].shape[1]
    FF = params["layers"][0]["w1_t"].shape[1]
    hd = D // nhead
    scale = 1.0 / math.sqrt(hd)

    din_pad = max(8, _round_up(Din, 8))      # sublane-aligned input projection
    dout_pad = _round_up(Dout, 128)          # lane-dense decoder output

    # Fold batch into rows; pad tiny K=Din feature dim to a sublane multiple.
    x_in = jnp.zeros((B * S, din_pad), jnp.float32).at[:, :Din].set(
        inp.reshape(B * S, Din).astype(jnp.float32))
    add_mask = jnp.where(padding_mask, NEG_MASK, 0.0).astype(jnp.float32)[:, None, :]

    w_in = jnp.zeros((din_pad, D), jnp.float32).at[:Din, :].set(
        params["w_in_t"]).astype(jnp.bfloat16)
    b_in = params["b_in"].astype(jnp.float32)

    def split_qkv_w(w):         # (D, 3D) -> (3*nhead, D, hd), Q pre-scaled
        wq = w[:, 0:D].reshape(D, nhead, hd) * scale
        wk = w[:, D:2 * D].reshape(D, nhead, hd)
        wv = w[:, 2 * D:].reshape(D, nhead, hd)
        return jnp.concatenate([wq, wk, wv], axis=1).transpose(1, 0, 2)

    def split_qkv_b(b):         # (1, 3D) -> (3*nhead, 1, hd), Q pre-scaled
        b3 = b.reshape(3, nhead, hd)
        b3 = b3.at[0].multiply(scale)
        return b3.reshape(3 * nhead, 1, hd)

    lp = params["layers"]
    w_qkvh = jnp.stack([split_qkv_w(p["w_qkv_t"]) for p in lp]).astype(jnp.bfloat16)
    b_qkvh = jnp.stack([split_qkv_b(p["b_qkv"]) for p in lp])
    w_oh = jnp.stack([p["w_o_t"].reshape(nhead, hd, D) for p in lp]).astype(jnp.bfloat16)
    b_o = jnp.stack([p["b_o"] for p in lp])
    ln1_g = jnp.stack([p["ln1_g"] for p in lp])
    ln1_b = jnp.stack([p["ln1_b"] for p in lp])
    w1 = jnp.stack([p["w1_t"] for p in lp]).astype(jnp.bfloat16)
    b1 = jnp.stack([p["b1"] for p in lp])
    w2 = jnp.stack([p["w2_t"] for p in lp]).astype(jnp.bfloat16)
    b2 = jnp.stack([p["b2"] for p in lp])
    ln2_g = jnp.stack([p["ln2_g"] for p in lp])
    ln2_b = jnp.stack([p["ln2_b"] for p in lp])

    w_dec = jnp.zeros((D, dout_pad), jnp.float32).at[:, :Dout].set(
        params["w_dec_t"]).astype(jnp.bfloat16)
    b_dec = jnp.zeros((1, dout_pad), jnp.float32).at[:, :Dout].set(params["b_dec"])

    args = (x_in, add_mask, w_in, b_in, w_qkvh, b_qkvh, w_oh, b_o,
            ln1_g, ln1_b, w1, b1, w2, b2, ln2_g, ln2_b, w_dec, b_dec)

    def lspec(*shape):          # per-layer weight: streamed along the layer axis
        return pl.BlockSpec((1,) + shape, lambda b, l: (l,) + (0,) * len(shape))

    def cspec(*shape):          # shared weight: constant block (fetched once)
        return pl.BlockSpec(shape, lambda b, l: (0,) * len(shape))

    in_specs = [
        pl.BlockSpec((S, din_pad), lambda b, l: (b, 0)),          # x_in (per batch)
        pl.BlockSpec((1, 1, S), lambda b, l: (b, 0, 0)),          # additive key mask
        cspec(din_pad, D), cspec(1, D),                           # input projection
        lspec(3 * nhead, D, hd), lspec(3 * nhead, 1, hd),         # head-batched QKV
        lspec(nhead, hd, D), lspec(1, D),                         # attn out projection
        lspec(1, D), lspec(1, D),                                 # layernorm 1
        lspec(D, FF), lspec(1, FF),                               # FFN 1
        lspec(FF, D), lspec(1, D),                                # FFN 2
        lspec(1, D), lspec(1, D),                                 # layernorm 2
        cspec(D, dout_pad), cspec(1, dout_pad),                   # decoder
    ]
    out_specs = [
        pl.BlockSpec((S, dout_pad), lambda b, l: (b, 0)),         # decoder out
        pl.BlockSpec((1, 1, S, S), lambda b, l: (l, b, 0, 0)),    # attn maps
    ]

    # Explicit VMEM budget: double-buffered input/output blocks + scratch.
    blk_bytes = sum(int(np.prod(spec.block_shape)) * a.dtype.itemsize
                    for spec, a in zip(in_specs, args))
    blk_bytes += (S * dout_pad + S * S) * 4                       # output blocks
    working_set = 2 * blk_bytes + S * D * 4                       # + x scratch
    vmem_limit_bytes = int(min(max(4 * working_set, 32 << 20), 64 << 20))

    kern = functools.partial(_fused_layer_kernel, nhead=nhead, S=S, D=D)
    out, attn = pl.pallas_call(
        kern,
        out_shape=(jax.ShapeDtypeStruct((B * S, dout_pad), jnp.float32),
                   jax.ShapeDtypeStruct((L, B, S, S), jnp.float32)),
        grid_spec=pltpu.PrefetchScalarGridSpec(
            num_scalar_prefetch=0,
            grid=(B, L),                     # batch outer (parallel), layer inner
            in_specs=in_specs,
            out_specs=out_specs,
            scratch_shapes=[pltpu.VMEM((S, D), jnp.float32)]),
        compiler_params=pltpu.CompilerParams(
            dimension_semantics=("parallel", "arbitrary"),
            vmem_limit_bytes=vmem_limit_bytes),
    )(*args)
    return out[:, :Dout].reshape(B, S, Dout), attn


# --------------------------- params & reference -----------------------------

def init_params(key, num_layers, d_model, input_size, output_size, dim_ff):
    keys = jax.random.split(key, 4 + num_layers)

    def rnd(k, shape, scale=0.1):
        return (scale * jax.random.normal(k, shape)).astype(jnp.float32)

    params = {
        "w_in_t": rnd(keys[0], (input_size, d_model)),
        "b_in": rnd(keys[1], (1, d_model)),
        "w_dec_t": rnd(keys[2], (d_model, output_size)),
        "b_dec": rnd(keys[3], (1, output_size)),
        "layers": [],
    }
    for l in range(num_layers):
        lk = jax.random.split(keys[4 + l], 8)
        params["layers"].append({
            "w_qkv_t": rnd(lk[0], (d_model, 3 * d_model)),
            "b_qkv": rnd(lk[1], (1, 3 * d_model)),
            "w_o_t": rnd(lk[2], (d_model, d_model)),
            "b_o": rnd(lk[3], (1, d_model)),
            "ln1_g": jnp.ones((1, d_model), jnp.float32),
            "ln1_b": jnp.zeros((1, d_model), jnp.float32),
            "w1_t": rnd(lk[4], (d_model, dim_ff)),
            "b1": rnd(lk[5], (1, dim_ff)),
            "w2_t": rnd(lk[6], (dim_ff, d_model)),
            "b2": rnd(lk[7], (1, d_model)),
            "ln2_g": jnp.ones((1, d_model), jnp.float32),
            "ln2_b": jnp.zeros((1, d_model), jnp.float32),
        })
    return params


def reference_forward(inp, padding_mask, params, nhead):
    """Pure-JAX reference mirroring PyTorch semantics (eval mode)."""
    x = inp @ params["w_in_t"] + params["b_in"]
    B, S, D = x.shape
    hd = D // nhead
    addm = jnp.where(padding_mask, NEG_MASK, 0.0)[:, None, None, :]
    attns = []
    for lp in params["layers"]:
        qkv = x @ lp["w_qkv_t"] + lp["b_qkv"]
        q, k, v = qkv[..., :D], qkv[..., D:2 * D], qkv[..., 2 * D:]
        qh = q.reshape(B, S, nhead, hd).transpose(0, 2, 1, 3) / math.sqrt(hd)
        kh = k.reshape(B, S, nhead, hd).transpose(0, 2, 1, 3)
        vh = v.reshape(B, S, nhead, hd).transpose(0, 2, 1, 3)
        s = jnp.einsum("bhqd,bhkd->bhqk", qh, kh) + addm
        p = jax.nn.softmax(s, axis=-1)
        attns.append(jnp.mean(p, axis=1))
        ctx = jnp.einsum("bhqk,bhkd->bhqd", p, vh).transpose(0, 2, 1, 3).reshape(B, S, D)
        sa = ctx @ lp["w_o_t"] + lp["b_o"]
        h1 = _layernorm(x + sa, lp["ln1_g"], lp["ln1_b"])
        ff = jax.nn.relu(h1 @ lp["w1_t"] + lp["b1"]) @ lp["w2_t"] + lp["b2"]
        x = _layernorm(h1 + ff, lp["ln2_g"], lp["ln2_b"])
    out = x @ params["w_dec_t"] + params["b_dec"]
    return out, jnp.stack(attns, axis=0)


if __name__ == "__main__":
    num_layers, d_model, nhead = 2, 32, 4
    input_size, output_size, dim_ff = 3, 20, 64
    B, S = 2, 8

    key = jax.random.PRNGKey(0)
    k_inp, k_par = jax.random.split(key)
    inp = jax.random.normal(k_inp, (B, S, input_size), dtype=jnp.float32)
    padding_mask = jnp.zeros((B, S), dtype=bool).at[1, -2:].set(True)
    params = init_params(k_par, num_layers, d_model, input_size, output_size, dim_ff)

    out, attn = transformer_regressor(inp, padding_mask, params, nhead)
    out, attn = jax.block_until_ready((out, attn))

    assert out.shape == (B, S, output_size)
    assert attn.shape == (num_layers, B, S, S)

    ref_out, ref_attn = reference_forward(inp, padding_mask, params, nhead)
    np.testing.assert_allclose(np.asarray(out), np.asarray(ref_out),
                               atol=1e-2, rtol=1e-2)
    np.testing.assert_allclose(np.asarray(attn), np.asarray(ref_attn),
                               atol=1e-2, rtol=1e-2)

    print("KERNEL_OK")
</pallas_src>

<mosaic_0001>
module attributes {stable_mosaic.version = 11 : i64} {
  func.func @_fused_layer_kernel(%arg0: i32, %arg1: i32, %arg2: memref<8x8xf32, #tpu.memory_space<vmem>>, %arg3: memref<1x1x8xf32, #tpu.memory_space<vmem>>, %arg4: memref<8x32xbf16, #tpu.memory_space<vmem>>, %arg5: memref<1x32xf32, #tpu.memory_space<vmem>>, %arg6: memref<1x12x32x8xbf16, #tpu.memory_space<vmem>>, %arg7: memref<1x12x1x8xf32, #tpu.memory_space<vmem>>, %arg8: memref<1x4x8x32xbf16, #tpu.memory_space<vmem>>, %arg9: memref<1x1x32xf32, #tpu.memory_space<vmem>>, %arg10: memref<1x1x32xf32, #tpu.memory_space<vmem>>, %arg11: memref<1x1x32xf32, #tpu.memory_space<vmem>>, %arg12: memref<1x32x64xbf16, #tpu.memory_space<vmem>>, %arg13: memref<1x1x64xf32, #tpu.memory_space<vmem>>, %arg14: memref<1x64x32xbf16, #tpu.memory_space<vmem>>, %arg15: memref<1x1x32xf32, #tpu.memory_space<vmem>>, %arg16: memref<1x1x32xf32, #tpu.memory_space<vmem>>, %arg17: memref<1x1x32xf32, #tpu.memory_space<vmem>>, %arg18: memref<32x128xbf16, #tpu.memory_space<vmem>>, %arg19: memref<1x128xf32, #tpu.memory_space<vmem>>, %arg20: memref<8x128xf32, #tpu.memory_space<vmem>>, %arg21: memref<1x1x8x8xf32, #tpu.memory_space<vmem>>, %arg22: memref<8x32xf32, #tpu.memory_space<vmem>>) attributes {dimension_semantics = [#tpu.dimension_semantics<parallel>, #tpu.dimension_semantics<arbitrary>], iteration_bounds = array<i64: 2, 2>, scalar_prefetch = 0 : i64, scratch_operands = 1 : i64, tpu.core_type = #tpu.core_type<tc>, window_params = [{transform_indices = @transform_0, window_bounds = array<i64: 8, 8>}, {transform_indices = @transform_1, window_bounds = array<i64: 1, 1, 8>}, {pipeline_mode = #tpu.pipeline_mode<synchronous>, transform_indices = @transform_2, window_bounds = array<i64: 8, 32>}, {pipeline_mode = #tpu.pipeline_mode<synchronous>, transform_indices = @transform_3, window_bounds = array<i64: 1, 32>}, {transform_indices = @transform_4, window_bounds = array<i64: 1, 12, 32, 8>}, {transform_indices = @transform_5, window_bounds = array<i64: 1, 12, 1, 8>}, {transform_indices = @transform_6, window_bounds = array<i64: 1, 4, 8, 32>}, {transform_indices = @transform_7, window_bounds = array<i64: 1, 1, 32>}, {transform_indices = @transform_8, window_bounds = array<i64: 1, 1, 32>}, {transform_indices = @transform_9, window_bounds = array<i64: 1, 1, 32>}, {transform_indices = @transform_10, window_bounds = array<i64: 1, 32, 64>}, {transform_indices = @transform_11, window_bounds = array<i64: 1, 1, 64>}, {transform_indices = @transform_12, window_bounds = array<i64: 1, 64, 32>}, {transform_indices = @transform_13, window_bounds = array<i64: 1, 1, 32>}, {transform_indices = @transform_14, window_bounds = array<i64: 1, 1, 32>}, {transform_indices = @transform_15, window_bounds = array<i64: 1, 1, 32>}, {pipeline_mode = #tpu.pipeline_mode<synchronous>, transform_indices = @transform_16, window_bounds = array<i64: 32, 128>}, {pipeline_mode = #tpu.pipeline_mode<synchronous>, transform_indices = @transform_17, window_bounds = array<i64: 1, 128>}, {transform_indices = @transform_18, window_bounds = array<i64: 8, 128>}, {transform_indices = @transform_19, window_bounds = array<i64: 1, 1, 8, 8>}]} {
    %c0_i32 = arith.constant 0 : i32
    %0 = arith.cmpi eq, %arg1, %c0_i32 : i32
    %1 = arith.extui %0 : i1 to i32
    %c0_i32_0 = arith.constant 0 : i32
    %2 = arith.cmpi ne, %1, %c0_i32_0 : i32
    scf.if %2 {
      %c0_72 = arith.constant 0 : index
      %c0_73 = arith.constant 0 : index
      %128 = vector.load %arg2[%c0_72, %c0_73] : memref<8x8xf32, #tpu.memory_space<vmem>>, vector<8x8xf32>
      %c0_74 = arith.constant 0 : index
      %c0_75 = arith.constant 0 : index
      %129 = vector.load %arg4[%c0_74, %c0_75] : memref<8x32xbf16, #tpu.memory_space<vmem>>, vector<8x32xbf16>
      %c0_76 = arith.constant 0 : index
      %c0_77 = arith.constant 0 : index
      %130 = vector.load %arg5[%c0_76, %c0_77] : memref<1x32xf32, #tpu.memory_space<vmem>>, vector<1x32xf32>
      %131 = arith.truncf %128 : vector<8x8xf32> to vector<8x8xbf16>
      %cst_78 = arith.constant dense<0.000000e+00> : vector<8x32xf32>
      %132 = tpu.matmul %131, %129, %cst_78 {dimension_numbers = #tpu.dot_dimension_numbers<[1], [0], [0], [1], [0, 0, 1, 1], [], []>} : vector<8x8xbf16>, vector<8x32xbf16>, vector<8x32xf32> -> vector<8x32xf32>
      %133 = vector.broadcast %130 : vector<1x32xf32> to vector<8x32xf32>
      %134 = arith.addf %132, %133 : vector<8x32xf32>
      %c0_79 = arith.constant 0 : index
      %c0_80 = arith.constant 0 : index
      %135 = vector.load %arg22[%c0_79, %c0_80] : memref<8x32xf32, #tpu.memory_space<vmem>>, vector<8x32xf32>
      tpu.vector_store %arg22[%c0_79, %c0_80], %134 {strides = array<i32>} : memref<8x32xf32, #tpu.memory_space<vmem>>, vector<8x32xf32>,
    } else {
    }
    %c0 = arith.constant 0 : index
    %c0_1 = arith.constant 0 : index
    %3 = vector.load %arg22[%c0, %c0_1] : memref<8x32xf32, #tpu.memory_space<vmem>>, vector<8x32xf32>
    %c0_2 = arith.constant 0 : index
    %c0_3 = arith.constant 0 : index
    %c0_4 = arith.constant 0 : index
    %4 = vector.load %arg3[%c0_2, %c0_3, %c0_4] : memref<1x1x8xf32, #tpu.memory_space<vmem>>, vector<1x1x8xf32>
    %5 = vector.shape_cast %4 : vector<1x1x8xf32> to vector<1x8xf32>
    %6 = arith.truncf %3 : vector<8x32xf32> to vector<8x32xbf16>
    %7 = vector.shape_cast %6 : vector<8x32xbf16> to vector<1x8x32xbf16>
    %8 = vector.shape_cast %7 : vector<1x8x32xbf16> to vector<1x8x32xbf16>
    %9 = vector.broadcast %8 : vector<1x8x32xbf16> to vector<12x8x32xbf16>
    %c0_5 = arith.constant 0 : index
    %c0_6 = arith.constant 0 : index
    %c0_7 = arith.constant 0 : index
    %c0_8 = arith.constant 0 : index
    %10 = vector.load %arg6[%c0_5, %c0_6, %c0_7, %c0_8] : memref<1x12x32x8xbf16, #tpu.memory_space<vmem>>, vector<1x12x32x8xbf16>
    %11 = vector.shape_cast %10 : vector<1x12x32x8xbf16> to vector<12x32x8xbf16>
    "tpu.trace_start"() <{level = 10 : i32, message = "hsd,hdf->hsf"}> : () -> ()
    %cst = arith.constant dense<0.000000e+00> : vector<12x8x8xf32>
    %12 = tpu.matmul %9, %11, %cst {dimension_numbers = #tpu.dot_dimension_numbers<[2], [1], [1], [2], [0, 0, 0, 1, 1, 2], [0], [0]>} : vector<12x8x32xbf16>, vector<12x32x8xbf16>, vector<12x8x8xf32> -> vector<12x8x8xf32>
    "tpu.trace_stop"() : () -> ()
    %c0_9 = arith.constant 0 : index
    %c0_10 = arith.constant 0 : index
    %c0_11 = arith.constant 0 : index
    %c0_12 = arith.constant 0 : index
    %13 = vector.load %arg7[%c0_9, %c0_10, %c0_11, %c0_12] : memref<1x12x1x8xf32, #tpu.memory_space<vmem>>, vector<1x12x1x8xf32>
    %14 = vector.shape_cast %13 : vector<1x12x1x8xf32> to vector<12x1x8xf32>
    %15 = vector.broadcast %14 : vector<12x1x8xf32> to vector<12x8x8xf32>
    %16 = arith.addf %12, %15 : vector<12x8x8xf32>
    %17 = vector.extract_strided_slice %16 {offsets = [0, 0, 0], sizes = [4, 8, 8], strides = [1, 1, 1]} : vector<12x8x8xf32> to vector<4x8x8xf32>
    %18 = vector.extract_strided_slice %16 {offsets = [4, 0, 0], sizes = [4, 8, 8], strides = [1, 1, 1]} : vector<12x8x8xf32> to vector<4x8x8xf32>
    %19 = vector.extract_strided_slice %16 {offsets = [8, 0, 0], sizes = [4, 8, 8], strides = [1, 1, 1]} : vector<12x8x8xf32> to vector<4x8x8xf32>
    %20 = arith.truncf %17 : vector<4x8x8xf32> to vector<4x8x8xbf16>
    %21 = arith.truncf %18 : vector<4x8x8xf32> to vector<4x8x8xbf16>
    "tpu.trace_start"() <{level = 10 : i32, message = "hqd,hkd->hqk"}> : () -> ()
    %cst_13 = arith.constant dense<0.000000e+00> : vector<4x8x8xf32>
    %22 = tpu.matmul %20, %21, %cst_13 {dimension_numbers = #tpu.dot_dimension_numbers<[2], [2], [1], [1], [0, 0, 0, 1, 1, 1], [0], [0]>} : vector<4x8x8xbf16>, vector<4x8x8xbf16>, vector<4x8x8xf32> -> vector<4x8x8xf32>
    "tpu.trace_stop"() : () -> ()
    %23 = vector.shape_cast %5 : vector<1x8xf32> to vector<1x1x8xf32>
    %24 = vector.broadcast %23 : vector<1x1x8xf32> to vector<4x8x8xf32>
    %25 = arith.addf %22, %24 : vector<4x8x8xf32>
    %cst_14 = arith.constant dense<0xFF800000> : vector<4x8xf32>
    %26 = vector.multi_reduction <maximumf>, %25, %cst_14 [2] : vector<4x8x8xf32> to vector<4x8xf32>
    %27 = vector.shape_cast %26 : vector<4x8xf32> to vector<4x8x1xf32>
    %28 = vector.broadcast %27 : vector<4x8x1xf32> to vector<4x8x8xf32>
    %29 = arith.subf %25, %28 : vector<4x8x8xf32>
    %30 = math.exp %29 : vector<4x8x8xf32>
    %cst_15 = arith.constant dense<0.000000e+00> : vector<4x8xf32>
    %31 = vector.multi_reduction <add>, %30, %cst_15 [2] : vector<4x8x8xf32> to vector<4x8xf32>
    %32 = vector.shape_cast %31 : vector<4x8xf32> to vector<4x8x1xf32>
    %33 = vector.broadcast %32 : vector<4x8x1xf32> to vector<4x8x8xf32>
    %34 = arith.divf %30, %33 : vector<4x8x8xf32>
    %cst_16 = arith.constant dense<0.000000e+00> : vector<8x8xf32>
    %35 = vector.multi_reduction <add>, %34, %cst_16 [0] : vector<4x8x8xf32> to vector<8x8xf32>
    %cst_17 = arith.constant 4.000000e+00 : f32
    %36 = vector.broadcast %cst_17 : f32 to vector<8x8xf32>
    %37 = arith.divf %35, %36 : vector<8x8xf32>
    %38 = vector.shape_cast %37 : vector<8x8xf32> to vector<1x1x8x8xf32>
    %c0_18 = arith.constant 0 : index
    %c0_19 = arith.constant 0 : index
    %c0_20 = arith.constant 0 : index
    %c0_21 = arith.constant 0 : index
    %39 = vector.load %arg21[%c0_18, %c0_19, %c0_20, %c0_21] : memref<1x1x8x8xf32, #tpu.memory_space<vmem>>, vector<1x1x8x8xf32>
    tpu.vector_store %arg21[%c0_18, %c0_19, %c0_20, %c0_21], %38 {strides = array<i32>} : memref<1x1x8x8xf32, #tpu.memory_space<vmem>>, vector<1x1x8x8xf32>,
    %40 = arith.truncf %34 : vector<4x8x8xf32> to vector<4x8x8xbf16>
    %41 = arith.truncf %19 : vector<4x8x8xf32> to vector<4x8x8xbf16>
    "tpu.trace_start"() <{level = 10 : i32, message = "hqk,hkd->hqd"}> : () -> ()
    %cst_22 = arith.constant dense<0.000000e+00> : vector<4x8x8xf32>
    %42 = tpu.matmul %40, %41, %cst_22 {dimension_numbers = #tpu.dot_dimension_numbers<[2], [1], [1], [2], [0, 0, 0, 1, 1, 2], [0], [0]>} : vector<4x8x8xbf16>, vector<4x8x8xbf16>, vector<4x8x8xf32> -> vector<4x8x8xf32>
    "tpu.trace_stop"() : () -> ()
    %43 = arith.truncf %42 : vector<4x8x8xf32> to vector<4x8x8xbf16>
    %c0_23 = arith.constant 0 : index
    %c0_24 = arith.constant 0 : index
    %c0_25 = arith.constant 0 : index
    %c0_26 = arith.constant 0 : index
    %44 = vector.load %arg8[%c0_23, %c0_24, %c0_25, %c0_26] : memref<1x4x8x32xbf16, #tpu.memory_space<vmem>>, vector<1x4x8x32xbf16>
    %45 = vector.shape_cast %44 : vector<1x4x8x32xbf16> to vector<4x8x32xbf16>
    "tpu.trace_start"() <{level = 10 : i32, message = "hqd,hdf->hqf"}> : () -> ()
    %cst_27 = arith.constant dense<0.000000e+00> : vector<4x8x32xf32>
    %46 = tpu.matmul %43, %45, %cst_27 {dimension_numbers = #tpu.dot_dimension_numbers<[2], [1], [1], [2], [0, 0, 0, 1, 1, 2], [0], [0]>} : vector<4x8x8xbf16>, vector<4x8x32xbf16>, vector<4x8x32xf32> -> vector<4x8x32xf32>
    "tpu.trace_stop"() : () -> ()
    %cst_28 = arith.constant dense<0.000000e+00> : vector<8x32xf32>
    %47 = vector.multi_reduction <add>, %46, %cst_28 [0] : vector<4x8x32xf32> to vector<8x32xf32>
    %c0_29 = arith.constant 0 : index
    %c0_30 = arith.constant 0 : index
    %c0_31 = arith.constant 0 : index
    %48 = vector.load %arg9[%c0_29, %c0_30, %c0_31] : memref<1x1x32xf32, #tpu.memory_space<vmem>>, vector<1x1x32xf32>
    %49 = vector.shape_cast %48 : vector<1x1x32xf32> to vector<1x32xf32>
    %50 = vector.broadcast %49 : vector<1x32xf32> to vector<8x32xf32>
    %51 = arith.addf %47, %50 : vector<8x32xf32>
    %52 = arith.addf %3, %51 : vector<8x32xf32>
    %c0_32 = arith.constant 0 : index
    %c0_33 = arith.constant 0 : index
    %c0_34 = arith.constant 0 : index
    %53 = vector.load %arg10[%c0_32, %c0_33, %c0_34] : memref<1x1x32xf32, #tpu.memory_space<vmem>>, vector<1x1x32xf32>
    %54 = vector.shape_cast %53 : vector<1x1x32xf32> to vector<1x32xf32>
    %c0_35 = arith.constant 0 : index
    %c0_36 = arith.constant 0 : index
    %c0_37 = arith.constant 0 : index
    %55 = vector.load %arg11[%c0_35, %c0_36, %c0_37] : memref<1x1x32xf32, #tpu.memory_space<vmem>>, vector<1x1x32xf32>
    %56 = vector.shape_cast %55 : vector<1x1x32xf32> to vector<1x32xf32>
    %cst_38 = arith.constant dense<0.000000e+00> : vector<8xf32>
    %57 = vector.multi_reduction <add>, %52, %cst_38 [1] : vector<8x32xf32> to vector<8xf32>
    %58 = vector.shape_cast %57 : vector<8xf32> to vector<8x1xf32>
    %cst_39 = arith.constant 3.200000e+01 : f32
    %59 = vector.broadcast %cst_39 : f32 to vector<8x1xf32>
    %60 = arith.divf %58, %59 : vector<8x1xf32>
    %61 = vector.broadcast %60 : vector<8x1xf32> to vector<8x32xf32>
    %62 = arith.subf %52, %61 : vector<8x32xf32>
    %63 = arith.mulf %62, %62 : vector<8x32xf32>
    %cst_40 = arith.constant dense<0.000000e+00> : vector<8xf32>
    %64 = vector.multi_reduction <add>, %63, %cst_40 [1] : vector<8x32xf32> to vector<8xf32>
    %65 = vector.shape_cast %64 : vector<8xf32> to vector<8x1xf32>
    %cst_41 = arith.constant 3.200000e+01 : f32
    %66 = vector.broadcast %cst_41 : f32 to vector<8x1xf32>
    %67 = arith.divf %65, %66 : vector<8x1xf32>
    %68 = vector.broadcast %60 : vector<8x1xf32> to vector<8x32xf32>
    %69 = arith.subf %52, %68 : vector<8x32xf32>
    %cst_42 = arith.constant 9.99999974E-6 : f32
    %70 = vector.broadcast %cst_42 : f32 to vector<8x1xf32>
    %71 = arith.addf %67, %70 : vector<8x1xf32>
    %72 = math.rsqrt %71 : vector<8x1xf32>
    %73 = vector.broadcast %72 : vector<8x1xf32> to vector<8x32xf32>
    %74 = arith.mulf %69, %73 : vector<8x32xf32>
    %75 = vector.broadcast %54 : vector<1x32xf32> to vector<8x32xf32>
    %76 = arith.mulf %74, %75 : vector<8x32xf32>
    %77 = vector.broadcast %56 : vector<1x32xf32> to vector<8x32xf32>
    %78 = arith.addf %76, %77 : vector<8x32xf32>
    %c0_43 = arith.constant 0 : index
    %c0_44 = arith.constant 0 : index
    %c0_45 = arith.constant 0 : index
    %79 = vector.load %arg12[%c0_43, %c0_44, %c0_45] : memref<1x32x64xbf16, #tpu.memory_space<vmem>>, vector<1x32x64xbf16>
    %80 = vector.shape_cast %79 : vector<1x32x64xbf16> to vector<32x64xbf16>
    %c0_46 = arith.constant 0 : index
    %c0_47 = arith.constant 0 : index
    %c0_48 = arith.constant 0 : index
    %81 = vector.load %arg13[%c0_46, %c0_47, %c0_48] : memref<1x1x64xf32, #tpu.memory_space<vmem>>, vector<1x1x64xf32>
    %82 = vector.shape_cast %81 : vector<1x1x64xf32> to vector<1x64xf32>
    %83 = arith.truncf %78 : vector<8x32xf32> to vector<8x32xbf16>
    %cst_49 = arith.constant dense<0.000000e+00> : vector<8x64xf32>
    %84 = tpu.matmul %83, %80, %cst_49 {dimension_numbers = #tpu.dot_dimension_numbers<[1], [0], [0], [1], [0, 0, 1, 1], [], []>} : vector<8x32xbf16>, vector<32x64xbf16>, vector<8x64xf32> -> vector<8x64xf32>
    %85 = vector.broadcast %82 : vector<1x64xf32> to vector<8x64xf32>
    %86 = arith.addf %84, %85 : vector<8x64xf32>
    %cst_50 = arith.constant 0.000000e+00 : f32
    %87 = vector.broadcast %cst_50 : f32 to vector<8x64xf32>
    %88 = arith.maximumf %86, %87 : vector<8x64xf32>
    %c0_51 = arith.constant 0 : index
    %c0_52 = arith.constant 0 : index
    %c0_53 = arith.constant 0 : index
    %89 = vector.load %arg14[%c0_51, %c0_52, %c0_53] : memref<1x64x32xbf16, #tpu.memory_space<vmem>>, vector<1x64x32xbf16>
    %90 = vector.shape_cast %89 : vector<1x64x32xbf16> to vector<64x32xbf16>
    %c0_54 = arith.constant 0 : index
    %c0_55 = arith.constant 0 : index
    %c0_56 = arith.constant 0 : index
    %91 = vector.load %arg15[%c0_54, %c0_55, %c0_56] : memref<1x1x32xf32, #tpu.memory_space<vmem>>, vector<1x1x32xf32>
    %92 = vector.shape_cast %91 : vector<1x1x32xf32> to vector<1x32xf32>
    %93 = arith.truncf %88 : vector<8x64xf32> to vector<8x64xbf16>
    %cst_57 = arith.constant dense<0.000000e+00> : vector<8x32xf32>
    %94 = tpu.matmul %93, %90, %cst_57 {dimension_numbers = #tpu.dot_dimension_numbers<[1], [0], [0], [1], [0, 0, 1, 1], [], []>} : vector<8x64xbf16>, vector<64x32xbf16>, vector<8x32xf32> -> vector<8x32xf32>
    %95 = vector.broadcast %92 : vector<1x32xf32> to vector<8x32xf32>
    %96 = arith.addf %94, %95 : vector<8x32xf32>
    %97 = arith.addf %78, %96 : vector<8x32xf32>
    %c0_58 = arith.constant 0 : index
    %c0_59 = arith.constant 0 : index
    %c0_60 = arith.constant 0 : index
    %98 = vector.load %arg16[%c0_58, %c0_59, %c0_60] : memref<1x1x32xf32, #tpu.memory_space<vmem>>, vector<1x1x32xf32>
    %99 = vector.shape_cast %98 : vector<1x1x32xf32> to vector<1x32xf32>
    %c0_61 = arith.constant 0 : index
    %c0_62 = arith.constant 0 : index
    %c0_63 = arith.constant 0 : index
    %100 = vector.load %arg17[%c0_61, %c0_62, %c0_63] : memref<1x1x32xf32, #tpu.memory_space<vmem>>, vector<1x1x32xf32>
    %101 = vector.shape_cast %100 : vector<1x1x32xf32> to vector<1x32xf32>
    %cst_64 = arith.constant dense<0.000000e+00> : vector<8xf32>
    %102 = vector.multi_reduction <add>, %97, %cst_64 [1] : vector<8x32xf32> to vector<8xf32>
    %103 = vector.shape_cast %102 : vector<8xf32> to vector<8x1xf32>
    %cst_65 = arith.constant 3.200000e+01 : f32
    %104 = vector.broadcast %cst_65 : f32 to vector<8x1xf32>
    %105 = arith.divf %103, %104 : vector<8x1xf32>
    %106 = vector.broadcast %105 : vector<8x1xf32> to vector<8x32xf32>
    %107 = arith.subf %97, %106 : vector<8x32xf32>
    %108 = arith.mulf %107, %107 : vector<8x32xf32>
    %cst_66 = arith.constant dense<0.000000e+00> : vector<8xf32>
    %109 = vector.multi_reduction <add>, %108, %cst_66 [1] : vector<8x32xf32> to vector<8xf32>
    %110 = vector.shape_cast %109 : vector<8xf32> to vector<8x1xf32>
    %cst_67 = arith.constant 3.200000e+01 : f32
    %111 = vector.broadcast %cst_67 : f32 to vector<8x1xf32>
    %112 = arith.divf %110, %111 : vector<8x1xf32>
    %113 = vector.broadcast %105 : vector<8x1xf32> to vector<8x32xf32>
    %114 = arith.subf %97, %113 : vector<8x32xf32>
    %cst_68 = arith.constant 9.99999974E-6 : f32
    %115 = vector.broadcast %cst_68 : f32 to vector<8x1xf32>
    %116 = arith.addf %112, %115 : vector<8x1xf32>
    %117 = math.rsqrt %116 : vector<8x1xf32>
    %118 = vector.broadcast %117 : vector<8x1xf32> to vector<8x32xf32>
    %119 = arith.mulf %114, %118 : vector<8x32xf32>
    %120 = vector.broadcast %99 : vector<1x32xf32> to vector<8x32xf32>
    %121 = arith.mulf %119, %120 : vector<8x32xf32>
    %122 = vector.broadcast %101 : vector<1x32xf32> to vector<8x32xf32>
    %123 = arith.addf %121, %122 : vector<8x32xf32>
    %c0_69 = arith.constant 0 : index
    %c0_70 = arith.constant 0 : index
    %124 = vector.load %arg22[%c0_69, %c0_70] : memref<8x32xf32, #tpu.memory_space<vmem>>, vector<8x32xf32>
    tpu.vector_store %arg22[%c0_69, %c0_70], %123 {strides = array<i32>} : memref<8x32xf32, #tpu.memory_space<vmem>>, vector<8x32xf32>,
    %c1_i32 = arith.constant 1 : i32
    %125 = arith.cmpi eq, %arg1, %c1_i32 : i32
    %126 = arith.extui %125 : i1 to i32
    %c0_i32_71 = arith.constant 0 : i32
    %127 = arith.cmpi ne, %126, %c0_i32_71 : i32
    scf.if %127 {
      %c0_72 = arith.constant 0 : index
      %c0_73 = arith.constant 0 : index
      %128 = vector.load %arg18[%c0_72, %c0_73] : memref<32x128xbf16, #tpu.memory_space<vmem>>, vector<32x128xbf16>
      %c0_74 = arith.constant 0 : index
      %c0_75 = arith.constant 0 : index
      %129 = vector.load %arg19[%c0_74, %c0_75] : memref<1x128xf32, #tpu.memory_space<vmem>>, vector<1x128xf32>
      %130 = arith.truncf %123 : vector<8x32xf32> to vector<8x32xbf16>
      %cst_76 = arith.constant dense<0.000000e+00> : vector<8x128xf32>
      %131 = tpu.matmul %130, %128, %cst_76 {dimension_numbers = #tpu.dot_dimension_numbers<[1], [0], [0], [1], [0, 0, 1, 1], [], []>} : vector<8x32xbf16>, vector<32x128xbf16>, vector<8x128xf32> -> vector<8x128xf32>
      %132 = vector.broadcast %129 : vector<1x128xf32> to vector<8x128xf32>
      %133 = arith.addf %131, %132 : vector<8x128xf32>
      %c0_77 = arith.constant 0 : index
      %c0_78 = arith.constant 0 : index
      %134 = vector.load %arg20[%c0_77, %c0_78] : memref<8x128xf32, #tpu.memory_space<vmem>>, vector<8x128xf32>
      tpu.vector_store %arg20[%c0_77, %c0_78], %133 {strides = array<i32>} : memref<8x128xf32, #tpu.memory_space<vmem>>, vector<8x128xf32>,
    } else {
    }
    return
  }
  func.func @transform_0(%arg0: i32, %arg1: i32) -> (i32, i32) {
    %c0_i32 = arith.constant 0 : i32
    %c0_i32_0 = arith.constant 0 : i32
    return %arg0, %c0_i32 : i32, i32
  }
  func.func @transform_1(%arg0: i32, %arg1: i32) -> (i32, i32, i32) {
    %c0_i32 = arith.constant 0 : i32
    %c0_i32_0 = arith.constant 0 : i32
    %c0_i32_1 = arith.constant 0 : i32
    return %arg0, %c0_i32, %c0_i32_0 : i32, i32, i32
  }
  func.func @transform_2(%arg0: i32, %arg1: i32) -> (i32, i32) {
    %c0_i32 = arith.constant 0 : i32
    %c0_i32_0 = arith.constant 0 : i32
    %c0_i32_1 = arith.constant 0 : i32
    return %c0_i32, %c0_i32_0 : i32, i32
  }
  func.func @transform_3(%arg0: i32, %arg1: i32) -> (i32, i32) {
    %c0_i32 = arith.constant 0 : i32
    %c0_i32_0 = arith.constant 0 : i32
    %c0_i32_1 = arith.constant 0 : i32
    return %c0_i32, %c0_i32_0 : i32, i32
  }
  func.func @transform_4(%arg0: i32, %arg1: i32) -> (i32, i32, i32, i32) {
    %c0_i32 = arith.constant 0 : i32
    %c0_i32_0 = arith.constant 0 : i32
    %c0_i32_1 = arith.constant 0 : i32
    %c0_i32_2 = arith.constant 0 : i32
    return %arg1, %c0_i32, %c0_i32_0, %c0_i32_1 : i32, i32, i32, i32
  }
  func.func @transform_5(%arg0: i32, %arg1: i32) -> (i32, i32, i32, i32) {
    %c0_i32 = arith.constant 0 : i32
    %c0_i32_0 = arith.constant 0 : i32
    %c0_i32_1 = arith.constant 0 : i32
    %c0_i32_2 = arith.constant 0 : i32
    return %arg1, %c0_i32, %c0_i32_0, %c0_i32_1 : i32, i32, i32, i32
  }
  func.func @transform_6(%arg0: i32, %arg1: i32) -> (i32, i32, i32, i32) {
    %c0_i32 = arith.constant 0 : i32
    %c0_i32_0 = arith.constant 0 : i32
    %c0_i32_1 = arith.constant 0 : i32
    %c0_i32_2 = arith.constant 0 : i32
    return %arg1, %c0_i32, %c0_i32_0, %c0_i32_1 : i32, i32, i32, i32
  }
  func.func @transform_7(%arg0: i32, %arg1: i32) -> (i32, i32, i32) {
    %c0_i32 = arith.constant 0 : i32
    %c0_i32_0 = arith.constant 0 : i32
    %c0_i32_1 = arith.constant 0 : i32
    return %arg1, %c0_i32, %c0_i32_0 : i32, i32, i32
  }
  func.func @transform_8(%arg0: i32, %arg1: i32) -> (i32, i32, i32) {
    %c0_i32 = arith.constant 0 : i32
    %c0_i32_0 = arith.constant 0 : i32
    %c0_i32_1 = arith.constant 0 : i32
    return %arg1, %c0_i32, %c0_i32_0 : i32, i32, i32
  }
  func.func @transform_9(%arg0: i32, %arg1: i32) -> (i32, i32, i32) {
    %c0_i32 = arith.constant 0 : i32
    %c0_i32_0 = arith.constant 0 : i32
    %c0_i32_1 = arith.constant 0 : i32
    return %arg1, %c0_i32, %c0_i32_0 : i32, i32, i32
  }
  func.func @transform_10(%arg0: i32, %arg1: i32) -> (i32, i32, i32) {
    %c0_i32 = arith.constant 0 : i32
    %c0_i32_0 = arith.constant 0 : i32
    %c0_i32_1 = arith.constant 0 : i32
    return %arg1, %c0_i32, %c0_i32_0 : i32, i32, i32
  }
  func.func @transform_11(%arg0: i32, %arg1: i32) -> (i32, i32, i32) {
    %c0_i32 = arith.constant 0 : i32
    %c0_i32_0 = arith.constant 0 : i32
    %c0_i32_1 = arith.constant 0 : i32
    return %arg1, %c0_i32, %c0_i32_0 : i32, i32, i32
  }
  func.func @transform_12(%arg0: i32, %arg1: i32) -> (i32, i32, i32) {
    %c0_i32 = arith.constant 0 : i32
    %c0_i32_0 = arith.constant 0 : i32
    %c0_i32_1 = arith.constant 0 : i32
    return %arg1, %c0_i32, %c0_i32_0 : i32, i32, i32
  }
  func.func @transform_13(%arg0: i32, %arg1: i32) -> (i32, i32, i32) {
    %c0_i32 = arith.constant 0 : i32
    %c0_i32_0 = arith.constant 0 : i32
    %c0_i32_1 = arith.constant 0 : i32
    return %arg1, %c0_i32, %c0_i32_0 : i32, i32, i32
  }
  func.func @transform_14(%arg0: i32, %arg1: i32) -> (i32, i32, i32) {
    %c0_i32 = arith.constant 0 : i32
    %c0_i32_0 = arith.constant 0 : i32
    %c0_i32_1 = arith.constant 0 : i32
    return %arg1, %c0_i32, %c0_i32_0 : i32, i32, i32
  }
  func.func @transform_15(%arg0: i32, %arg1: i32) -> (i32, i32, i32) {
    %c0_i32 = arith.constant 0 : i32
    %c0_i32_0 = arith.constant 0 : i32
    %c0_i32_1 = arith.constant 0 : i32
    return %arg1, %c0_i32, %c0_i32_0 : i32, i32, i32
  }
  func.func @transform_16(%arg0: i32, %arg1: i32) -> (i32, i32) {
    %c0_i32 = arith.constant 0 : i32
    %c0_i32_0 = arith.constant 0 : i32
    %c0_i32_1 = arith.constant 0 : i32
    return %c0_i32, %c0_i32_0 : i32, i32
  }
  func.func @transform_17(%arg0: i32, %arg1: i32) -> (i32, i32) {
    %c0_i32 = arith.constant 0 : i32
    %c0_i32_0 = arith.constant 0 : i32
    %c0_i32_1 = arith.constant 0 : i32
    return %c0_i32, %c0_i32_0 : i32, i32
  }
  func.func @transform_18(%arg0: i32, %arg1: i32) -> (i32, i32) {
    %c0_i32 = arith.constant 0 : i32
    %c0_i32_0 = arith.constant 0 : i32
    return %arg0, %c0_i32 : i32, i32
  }
  func.func @transform_19(%arg0: i32, %arg1: i32) -> (i32, i32, i32, i32) {
    %c0_i32 = arith.constant 0 : i32
    %c0_i32_0 = arith.constant 0 : i32
    %c0_i32_1 = arith.constant 0 : i32
    return %arg1, %arg0, %c0_i32, %c0_i32_0 : i32, i32, i32, i32
  }
}

</mosaic_0001>

<bundles_post_ra>
// kernel: tpu_custom_call.1
= control target key start
LH: loop header
LB: loop body
LE: loop exit
PB: predicated region body
PF: predicated region fallthrough
CT: control target
= control target key end

     0   :  { %s3216_s0 = inlined_call_operand.vmem [shape: f32[16,8], index: 0, kind: input, shape index: {}]   ;;  %s3217_s1 = inlined_call_operand.vmem [shape: f32[2,1,8], index: 1, kind: input, shape index: {}]   ;;  %s3218_s2 = inlined_call_operand.vmem [shape: bf16[8,32], index: 2, kind: input, shape index: {}]   ;;  %s3219_s3 = inlined_call_operand.vmem [shape: f32[1,32], index: 3, kind: input, shape index: {}]   ;;  %s3220_s4 = inlined_call_operand.vmem [shape: bf16[2,12,32,8], index: 4, kind: input, shape index: {}]   ;;  %s3221_s5 = inlined_call_operand.vmem [shape: f32[2,12,1,8], index: 5, kind: input, shape index: {}]   ;;  %s3222_s6 = inlined_call_operand.vmem [shape: bf16[2,4,8,32], index: 6, kind: input, shape index: {}]   ;;  %s3223_s7 = inlined_call_operand.vmem [shape: f32[2,1,32], index: 7, kind: input, shape index: {}]   ;;  %s3224_s8 = inlined_call_operand.vmem [shape: f32[2,1,32], index: 8, kind: input, shape index: {}]   ;;  %s3225_s9 = inlined_call_operand.vmem [shape: f32[2,1,32], index: 9, kind: input, shape index: {}]   ;;  %s3226_s10 = inlined_call_operand.vmem [shape: bf16[2,32,64], index: 10, kind: input, shape index: {}]   ;;  %s3227_s11 = inlined_call_operand.vmem [shape: f32[2,1,64], index: 11, kind: input, shape index: {}]   ;;  %s3228_s12 = inlined_call_operand.vmem [shape: bf16[2,64,32], index: 12, kind: input, shape index: {}]   ;;  %s3229_s13 = inlined_call_operand.vmem [shape: f32[2,1,32], index: 13, kind: input, shape index: {}]   ;;  %s3230_s14 = inlined_call_operand.vmem [shape: f32[2,1,32], index: 14, kind: input, shape index: {}]   ;;  %s3231_s15 = inlined_call_operand.vmem [shape: f32[2,1,32], index: 15, kind: input, shape index: {}]   ;;  %s3232_s16 = inlined_call_operand.vmem [shape: bf16[32,128], index: 16, kind: input, shape index: {}]   ;;  %s3233_s17 = inlined_call_operand.vmem [shape: f32[1,128], index: 17, kind: input, shape index: {}]   ;;  %s3234_s18 = inlined_call_operand.hbm [shape: f32[16,128], index: 18, kind: output, shape index: {0}]   ;;  %s3235_s19 = inlined_call_operand.hbm [shape: f32[2,2,8,8], index: 19, kind: output, shape index: {1}]  }
   0x1   :  { %3262 = sst [smem:[#allocation28_spill]] %s3216_s0 }
   0x2   :  { %3263 = sst [smem:[#allocation29_spill]] %s3217_s1 }
   0x3   :  { %3264 = sst [smem:[#allocation30_spill]] %s3218_s2 }
   0x4   :  { %3265 = sst [smem:[#allocation31_spill]] %s3219_s3 }
   0x5   :  { %3266 = sst [smem:[#allocation32_spill]] %s3220_s4 }
   0x6   :  { %3267 = sst [smem:[#allocation33_spill]] %s3221_s5 }
   0x7   :  { %3268 = sst [smem:[#allocation34_spill]] %s3222_s6 }
   0x8   :  { %3269 = sst [smem:[#allocation35_spill]] %s3224_s8 }
   0x9   :  { %3270 = sst [smem:[#allocation36_spill]] %s3225_s9 }
   0xa   :  { %3271 = sst [smem:[#allocation37_spill]] %s3226_s10 }
   0xb   :  { %3272 = sst [smem:[#allocation38_spill]] %s3228_s12 }
   0xc   :  { %3273 = sst [smem:[#allocation39_spill]] %s3230_s14 }
   0xd   :  { %3274 = sst [smem:[#allocation40_spill]] %s3231_s15 }
   0xe   :  { %3275 = sst [smem:[#allocation41_spill]] %s3232_s16 }
   0xf   :  { %3276 = sst [smem:[#allocation42_spill]] %s3233_s17 }
  0x10   :  { %3277 = sst [smem:[#allocation43_spill]] %s3234_s18 }
  0x11   :  { %3278 = sst [smem:[#allocation44_spill]] %s3235_s19 }
  0x12   :  { %25 = vsyncpa [#allocation4], 0 }
  0x13   :  { %27 = vsyncpa [#allocation4 + $0x1], 0 }
  0x14   :  { %28 = vsyncpa [#allocation6], 0 }
  0x15   :  { %30 = vsyncpa [#allocation6 + $0x1], 0  ;;  %s2752_s0 = smov 0   ;;  %s2754_s30 = smov 0  }
  0x16   :  { %s2756_s20 = smov 0   ;;  %s2758_s21 = smov 0  }
  0x17   :  { %s2760_s1 = smov 0   ;;  %s2762_s22 = smov 0  }
  0x18   :  { %s2764_s2 = smov 0   ;;  %s2766_s23 = smov 0  }
  0x19   :  { %s2768_s24 = smov 0   ;;  %s2770_s25 = smov 0  }
  0x1a   :  { %s2772_s3 = smov 0  }
  0x1b LB: > { %3279 = sst [smem:[#allocation9_spill]] %s2608_s0  ;;  %s2133_s26 = sadd.s32 4294967295, %s2648_s3   ;;  %s2648_s3 = sphi %s2772_s3, %s36_s3   ;;  %s2644_s25 = sphi %s2770_s25, %s3353_s25   ;;  %s2640_s24 = sphi %s2768_s24, %s3352_s24   ;;  %s2636_s23 = sphi %s2766_s23, %s3351_s23   ;;  %s2632_s2 = sphi %s2764_s2, %s3350_s2   ;;  %s2628_s22 = sphi %s2762_s22, %s3349_s22   ;;  %s2624_s1 = sphi %s2760_s1, %s3348_s1   ;;  %s2620_s21 = sphi %s2758_s21, %s3347_s21   ;;  %s2616_s20 = sphi %s2756_s20, %s3346_s20   ;;  %s2612_s30 = sphi %s2754_s30, %s3345_s30   ;;  %s2608_s0 = sphi %s2752_s0, %s3344_s0  }
  0x1c   : > { %3280 = sst [smem:[#allocation10_spill]] %s2612_s30  ;;  %s2134_s27 = sadd.s32 4294967294, %s2648_s3  }
  0x1d   : > { %3281 = sst [smem:[#allocation11_spill]] %s2616_s20  ;;  %s45_s28 = sadd.s32 1, %s2640_s24 }
  0x1e   : > { %3282 = sst [smem:[#allocation12_spill]] %s2620_s21  ;;  %s48_s29 = sadd.s32 1, %s2644_s25 }
  0x1f   : > { %3283 = sst [smem:[#allocation13_spill]] %s2624_s1  ;;  %p46_p0 = scmp.ge.s32.totalorder %s45_s28, 2 }
  0x20   : > { %3284 = sst [smem:[#allocation14_spill]] %s2628_s22  ;;  %s503_s19 = sadd.s32 1, %s2628_s22 }
  0x21   : > { %3285 = sst [smem:[#allocation15_spill]] %s2636_s23  ;;  %p513_p1 = scmp.ne.s32.totalorder %s2628_s22, %s2624_s1 }
  0x22   : > { %3286 = sst [smem:[#allocation16_spill]] %s2640_s24  ;;  %p2814_p2 = scmp.eq.s32.totalorder %s2133_s26, 3 }
  0x23   : > { %3287 = sst [smem:[#allocation17_spill]] %s2644_s25  ;;  %s3355_s28 = smov (%p46_p0, %s45_s28), 0 }
  0x24   : > { %3288 = sst [smem:[#allocation18_spill]] %s2648_s3  ;;  %s3357_s29 = smov (!%p46_p0, %s48_s29), %s2644_s25 }
  0x25   : > { %3290 = sst [smem:[#allocation19_spill]] %s3355_s28  ;;  %p2823_p3 = por %p2814_p2, %p513_p1 }
  0x26   : > { %p519_p4 = scmp.ne.s32.totalorder %s2624_s1, %s2620_s21  ;;  %p50_p5 = scmp.ge.s32.totalorder %s3357_s29, 2 }
  0x27   : > { %s3291_s17 = scalar_select %p2823_p3, 1, 0 }
  0x28   : > { %p2829_p6 = scmp.eq.s32.totalorder %s2134_s27, 3  ;;  %s526_s16 = ssub.s32 %s2640_s24, %s3355_s28 }
  0x29   : > { %3292 = sst [smem:[#allocation20_spill]] %s3291_s17  ;;  %s531_s15 = sadd.s32 1, %s2616_s20 }
  0x2a   : > { %s3359_s29 = smov (%p50_p5, %s3357_s29), 0  ;;  %p2840_p7 = por %p2829_p6, %p519_p4 }
  0x2b   : > { %3294 = sst [smem:[#allocation21_spill]] %s3359_s29  ;;  %p541_p8 = scmp.ne.s32.totalorder %s2616_s20, %s2612_s30 }
  0x2c   : > { %s3295_s14 = scalar_select %p2840_p7, 1, 0 }
  0x2d   : > { %s500_s21 = ssub.s32 %s2644_s25, %s3359_s29  ;;  %p547_p9 = scmp.ne.s32.totalorder %s2612_s30, %s2608_s0 }
  0x2e   : > { %3296 = sst [smem:[#allocation22_spill]] %s3295_s14  ;;  %p501_p10 = scmp.eq.s32.totalorder %s500_s21, 0 }
  0x2f   : > { %s528_s27 = sor.u32 %s526_s16, %s500_s21  ;;  %p2852_p12 = por %p541_p8, %p2814_p2 }
  0x30   : > { %p529_p11 = scmp.eq.s32.totalorder %s528_s27, 0  ;;  %p2864_p13 = por %p547_p9, %p2829_p6 }
  0x31   : > { %s3297_s17 = scalar_select %p2852_p12, 1, 0 }
  0x32   : > { %s2857_s28 = scalar_select %p501_p10, %s2628_s22, %s503_s19  }
  0x33   : > { %3298 = sst [smem:[#allocation23_spill]] %s3297_s17  ;;  %p2137_p0 = scmp.ge.s32.totalorder %s2648_s3, 1 }
  0x34   : > { %3299 = sst [smem:[#allocation24_spill]] %s2857_s28  ;;  %p672_p1 = scmp.lt.s32.totalorder %s2648_s3, 5 }
  0x35   : > { %s2860_s24 = scalar_select %p529_p11, %s2616_s20, %s531_s15  }
  0x36   : > { %s3301_s12 = scalar_select %p2864_p13, 1, 0 }
  0x37   : > { %3300 = sst [smem:[#allocation25_spill]] %s2860_s24  ;;  %p673_p4 = pnand %p2137_p0, %p672_p1 }
  0x38   : > { %3302 = sst [smem:[#allocation26_spill]] %s3301_s12 }
  0x39   : > { %676 = sbr.rel (%p673_p4) target bundleno = 2063 (0x80f), region = 92 }
  0x3e   : > { %s3245_s16 = sand.u32 1, %s2624_s1   ;;  %s3244_s15 = sand.u32 1, %s2612_s30  }
  0x3f   : > { %s2874_s18 = sshll.u32 %s3245_s16, 3  ;;  %s2878_s19 = sshll.u32 %s3244_s15, 3 }
  0x40   : > { %p780_p2 = scmp.lt.s32.totalorder %s2636_s23, 1  ;;  %p787_p5 = scmp.lt.s32.totalorder %s2632_s2, 1 }
  0x41   : > { %s3305_s24 = sld [smem:[#allocation28_spill]]  ;;  %s772_s16 = scalar_lea.vmem [#allocation3], %s2874_s18 }
  0x42   : > { %s2883_s21 = scalar_select %p780_p2, %s2636_s23, 1 }
  0x43   : > { %s2886_s26 = scalar_select %p787_p5, %s2632_s2, 1 }
  0x44   : > { %3303 = sst [smem:[#allocation27_spill]] %s2883_s21  ;;  %s2140_s27 = sshll.u32 %s2883_s21, 3 }
  0x45   : > { %s2348_s12 = smul.u32 192, %s2886_s26  ;;  %s2313_s14 = sshll.u32 %s2886_s26, 4 }
  0x46   : > { %s2349_s0 = smul.u32 12, %s2886_s26  ;;  %s3306_s4 = sld [smem:[#allocation32_spill]] }
  0x47   : > { %s783_s20 = scalar_lea.vmem %s3305_s24, %s2140_s27  ;;  %s3307_s6 = sld [smem:[#allocation34_spill]] }
  0x48   : > { %s3308_s5 = sld [smem:[#allocation33_spill]]  ;;  %s817_s22 = scalar_lea.vmem %s3227_s11, %s2886_s26 }
  0x49   : > { %s3311_s10 = sld [smem:[#allocation37_spill]]  ;;  %p2148_p6 = scmp.ne.s32.totalorder %s2632_s2, 0 }
  0x4a   : > { %s3312_s17 = sld [smem:[#allocation38_spill]] }
  0x4b   : > { %s3315_s27 = sld [smem:[#allocation30_spill]] (!%p2148_p6) }
  0x4c   : > { %s2902_s30 = scalar_lea.vmem %s3306_s4, %s2348_s12  ;;  %s3313_s4 = sld [smem:[#allocation39_spill]] }
  0x4d   : > { %s2907_s29 = scalar_lea.vmem %s3307_s6, %s2313_s14 }
  0x4e   : > { %s2912_s24 = scalar_lea.vmem %s3308_s5, %s2349_s0  ;;  %s2315_s5 = sshll.u32 %s2886_s26, 5 }
  0x4f   : > { %s2929_s6 = scalar_lea.vmem %s3311_s10, %s2313_s14  ;;  %s3314_s10 = sld [smem:[#allocation40_spill]] }
  0x50   : > { %s2943_s8 = scalar_lea.vmem %s3312_s17, %s2315_s5  ;;  %s779_s0 = scalar_lea.vmem [#allocation5], %s2878_s19 }
  0x51   : > { %836 = sbr.rel (%p2148_p6) target bundleno = 225 (0xe1), region = 96  ;;  %s3316_s17 = sld [smem:[#allocation31_spill]] (!%p2148_p6) }
  0x52   : > { %s828_s1 = scalar_lea.vmem %s3313_s4, %s2886_s26 }
  0x55   : > { %s831_s9 = scalar_lea.vmem %s3314_s10, %s2886_s26 }
  0x56   : > { %v838_v0 = vld [vmem:[%s3315_s27] sm:$0xf]  ;;  %vm848_vm0 = vcmask 1043456   ;;  %vm844_vm1 = vcmask 64512   ;;  %vm865_vm2 = vcmask 261120  }
  0x57   : > { %v837_v1 = vld [vmem:[%s783_s20] sm:$0xff]  ;;  %v850_v2 = vsel %vm848_vm0, %v838_v0, 0 }
  0x58   : > { %v840_v3 = vpack.c.bf16 %v837_v1, %v837_v1  ;;  %859 = vmatpush.bf16.msra.mxu0 %v850_v2  ;;  %v2452_v4 = vld [vmem:[%s3316_s17] ss:$0 sm:$0xff] }
  0x5b   : > { %2149 = vmatmul.msk.bf16.vlgmr.msra.gmra.mxu0 %vm844_vm1, %v840_v3 }
  0xd8   : > { %v861_v5 = vpop.f32.mrf.mxu0 }
  0xd9   : > { %v862_v6 = vadd.f32 %v2452_v4, %v861_v5 }
  0xdb   : > { %866 = vst.msk [vmem:[#allocation2] sm:$0xff] %vm865_vm2, %v862_v6 }
  0xe0   : > { %v863_v7 = vpop.f32.mrf.mxu0 }
  0xe1 PF: > { %v2317_v8 = vld [vmem:[%s2902_s30 + $0x8] sm:$0xff]  ;;  %v2319_v9 = vld [vmem:[%s2902_s30 + $0x18] sm:$0xff]  ;;  %v2316_v12 = vld [vmem:[%s2902_s30] sm:$0xff]  ;;  %vm978_vm3 = vcmask 261120   ;;  %vm1281_vm4 = vcmask 64512   ;;  %vm1481_vm5 = vcmask 1043456   ;;  %s3320_s21 = scalar_lea.vmem %s3223_s7, %s2886_s26  ;;  %s3325_s20 = scalar_lea.vmem %s3229_s13, %s2886_s26 }
  0xe2   : > { %v2321_v10 = vld [vmem:[%s2902_s30 + $0x28] sm:$0xff]  ;;  %v2323_v11 = vld [vmem:[%s2902_s30 + $0x38] sm:$0xff]  ;;  %988 = vmatpush.bf16.msra.mxu0 %v2317_v8  ;;  %1013 = vmatpush.bf16.msra.mxu1 %v2319_v9  ;;  %v2318_v13 = vld [vmem:[%s2902_s30 + $0x10] sm:$0xff]  ;;  %s3317_s10 = sld [smem:[#allocation27_spill]]  ;;  %p2296_p8 = scmp.ne.s32.totalorder %s2632_s2, 1 }
  0xe3   : > { %v2968_v14 = vld [vmem:[#allocation2] sm:$0xff]  ;;  %1038 = vmatpush.bf16.msra.mxu2 %v2321_v10  ;;  %1063 = vmatpush.bf16.msra.mxu3 %v2323_v11  ;;  %v2322_v16 = vld [vmem:[%s2902_s30 + $0x30] sm:$0xff]  ;;  %v2325_v17 = vld [vmem:[%s2902_s30 + $0x48] sm:$0xff]  ;;  %s3318_s27 = sld [smem:[#allocation29_spill]] }
  0xe4   : > { %v2320_v15 = vld [vmem:[%s2902_s30 + $0x20] sm:$0xff]  ;;  %v2327_v18 = vld [vmem:[%s2902_s30 + $0x58] sm:$0xff]  ;;  %v869_v19 = vpack.c.bf16 %v2968_v14, %v2968_v14  ;;  %v2329_v20 = vld [vmem:[%s2902_s30 + $0x68] sm:$0xff]  ;;  %s3321_s3 = sld [smem:[#allocation35_spill]] }
  0xe5   : > { %v2331_v21 = vld [vmem:[%s2902_s30 + $0x78] sm:$0xff]  ;;  %v2324_v22 = vld [vmem:[%s2902_s30 + $0x40] sm:$0xff]  ;;  %v2326_v23 = vld [vmem:[%s2902_s30 + $0x50] sm:$0xff]  ;;  %s3323_s15 = sld [smem:[#allocation36_spill]] }
  0xe6   : > { %989 = vmatpush.bf16.msra.mxu0 %v2316_v12  ;;  %1014 = vmatpush.bf16.msra.mxu1 %v2318_v13  ;;  %v2328_v24 = vld [vmem:[%s2902_s30 + $0x60] sm:$0xff]  ;;  %v2330_v25 = vld [vmem:[%s2902_s30 + $0x70] sm:$0xff]  ;;  %v2337_v26 = vld [vmem:[%s2902_s30 + $0xa8] sm:$0xff]  ;;  %s3328_s12 = sld [smem:[#allocation41_spill]] (!%p2296_p8) }
  0xe7   : > { %1039 = vmatpush.bf16.msra.mxu2 %v2320_v15  ;;  %1064 = vmatpush.bf16.msra.mxu3 %v2322_v16  ;;  %v2333_v27 = vld [vmem:[%s2902_s30 + $0x88] sm:$0xff]  ;;  %v2335_v28 = vld [vmem:[%s2902_s30 + $0x98] sm:$0xff]  ;;  %v2336_v29 = vld [vmem:[%s2902_s30 + $0xa0] sm:$0xff] }
  0xe8   : > { %v2332_v30 = vld [vmem:[%s2902_s30 + $0x80] sm:$0xff]  ;;  %v2334_v31 = vld [vmem:[%s2902_s30 + $0x90] sm:$0xff]  ;;  %v2339_v32 = vld [vmem:[%s2902_s30 + $0xb8] sm:$0xff] }
  0xe9   : > { %2158 = vmatmul.msk.bf16.vlgmr.msra.gmra.mxu0 %vm978_vm3, %v869_v19  ;;  %2167 = vmatmul.msk.bf16.vlgmr.msra.gmra.mxu1 %vm978_vm3, %v869_v19  ;;  %v2338_v33 = vld [vmem:[%s2902_s30 + $0xb0] sm:$0xff]  ;;  %v2457_v40 = vld [vmem:[%s2912_s24 + $0x4] ss:$0 sm:$0xff]  ;;  %v2458_v41 = vld [vmem:[%s2912_s24 + $0x5] ss:$0 sm:$0xff]  ;;  %s3319_s25 = scalar_lea.vmem %s3318_s27, %s3317_s10 }
  0xea   : > { %1088 = vmatpush.bf16.msrb.mxu0 %v2325_v17  ;;  %1113 = vmatpush.bf16.msrb.mxu1 %v2327_v18  ;;  %v2454_v48 = vld [vmem:[%s2912_s24 + $0x1] ss:$0 sm:$0xff]  ;;  %v2453_v51 = vld [vmem:[%s2912_s24] ss:$0 sm:$0xff]  ;;  %v2459_v52 = vld [vmem:[%s2912_s24 + $0x6] ss:$0 sm:$0xff]  ;;  %s3322_s14 = scalar_lea.vmem %s3321_s3, %s2886_s26 }
  0xeb   : > { %2176 = vmatmul.msk.bf16.vlgmr.msra.gmra.mxu2 %vm978_vm3, %v869_v19  ;;  %2185 = vmatmul.msk.bf16.vlgmr.msra.gmra.mxu3 %vm978_vm3, %v869_v19  ;;  %v2460_v53 = vld [vmem:[%s2912_s24 + $0x7] ss:$0 sm:$0xff]  ;;  %v2455_v1 = vld [vmem:[%s2912_s24 + $0x2] ss:$0 sm:$0xff]  ;;  %v2456_v2 = vld [vmem:[%s2912_s24 + $0x3] ss:$0 sm:$0xff]  ;;  %s3324_s4 = scalar_lea.vmem %s3323_s15, %s2886_s26 }
  0xec   : > { %1138 = vmatpush.bf16.msrb.mxu2 %v2329_v20  ;;  %1163 = vmatpush.bf16.msrb.mxu3 %v2331_v21  ;;  %v2461_v15 = vld [vmem:[%s2912_s24 + $0x8] ss:$0 sm:$0xff]  ;;  %v2462_v16 = vld [vmem:[%s2912_s24 + $0x9] ss:$0 sm:$0xff]  ;;  %v2463_v21 = vld [vmem:[%s2912_s24 + $0xa] ss:$0 sm:$0xff] }
  0xee   : > { %1089 = vmatpush.bf16.msrb.mxu0 %v2324_v22  ;;  %1114 = vmatpush.bf16.msrb.mxu1 %v2326_v23 }
  0xf0   : > { %1139 = vmatpush.bf16.msrb.mxu2 %v2328_v24  ;;  %1164 = vmatpush.bf16.msrb.mxu3 %v2330_v25 }
  0xf2   : > { %1188 = vmatpush.bf16.msra.mxu0 %v2333_v27  ;;  %1213 = vmatpush.bf16.msra.mxu1 %v2335_v28 }
  0xf4   : > { %1238 = vmatpush.bf16.msra.mxu2 %v2337_v26  ;;  %1263 = vmatpush.bf16.msra.mxu3 %v2339_v32  ;;  %v2464_v32 = vld [vmem:[%s2912_s24 + $0xb] ss:$0 sm:$0xff] }
  0xf6   : > { %1189 = vmatpush.bf16.msra.mxu0 %v2332_v30  ;;  %1214 = vmatpush.bf16.msra.mxu1 %v2334_v31 }
  0xf8   : > { %1239 = vmatpush.bf16.msra.mxu2 %v2336_v29  ;;  %1264 = vmatpush.bf16.msra.mxu3 %v2338_v33 }
  0xf9   : > { %2194 = vmatmul.msk.bf16.vlgmr.msrb.gmra.mxu0 %vm978_vm3, %v869_v19  ;;  %2203 = vmatmul.msk.bf16.vlgmr.msrb.gmra.mxu1 %vm978_vm3, %v869_v19 }
  0xfb   : > { %2212 = vmatmul.msk.bf16.vlgmr.msrb.gmra.mxu2 %vm978_vm3, %v869_v19  ;;  %2221 = vmatmul.msk.bf16.vlgmr.msrb.gmra.mxu3 %vm978_vm3, %v869_v19 }
 0x109   : > { %2230 = vmatmul.msk.bf16.vlgmr.msra.gmra.mxu0 %vm978_vm3, %v869_v19  ;;  %2239 = vmatmul.msk.bf16.vlgmr.msra.gmra.mxu1 %vm978_vm3, %v869_v19 }
 0x10b   : > { %2248 = vmatmul.msk.bf16.vlgmr.msra.gmra.mxu2 %vm978_vm3, %v869_v19  ;;  %2257 = vmatmul.msk.bf16.vlgmr.msra.gmra.mxu3 %vm978_vm3, %v869_v19 }
 0x166   : > { %v991_v34 = vpop.f32.mrf.mxu0  ;;  %v1016_v35 = vpop.f32.mrf.mxu1 }
 0x167   : > { %v1017_v56 = vadd.f32 %v2454_v48, %v1016_v35  ;;  %v992_v59 = vadd.f32 %v2453_v51, %v991_v34 }
 0x169   : > { %v1271_v0 = vpack.c.bf16 %v1017_v56, %v1017_v56  ;;  %v1270_v5 = vpack.c.bf16 %v992_v59, %v992_v59 }
 0x16e   : > { %v1041_v36 = vpop.f32.mrf.mxu2  ;;  %v1066_v37 = vpop.f32.mrf.mxu3 }
 0x16f   : > { %v993_v38 = vpop.f32.mrf.mxu0  ;;  %v1018_v39 = vpop.f32.mrf.mxu1  ;;  %v1042_v8 = vadd.f32 %v2455_v1, %v1041_v36  ;;  %v1067_v9 = vadd.f32 %v2456_v2, %v1066_v37 }
 0x170   : > { %v2465_v39 = vld [vmem:[%s3319_s25] ss:$0 sm:$0xff] }
 0x171   : > { %v1272_v12 = vpack.c.bf16 %v1042_v8, %v1042_v8  ;;  %v1273_v13 = vpack.c.bf16 %v1067_v9, %v1067_v9 }
 0x176   : > { %v1043_v42 = vpop.f32.mrf.mxu2  ;;  %v1068_v43 = vpop.f32.mrf.mxu3 }
 0x177   : > { %v1091_v44 = vpop.f32.mrf.mxu0  ;;  %v1116_v45 = vpop.f32.mrf.mxu1 }
 0x178   : > { %v1092_v46 = vadd.f32 %v2457_v40, %v1091_v44  ;;  %v1117_v47 = vadd.f32 %v2458_v41, %v1116_v45 }
 0x17a   : > { %v1274_v49 = vpack.c.bf16 %v1092_v46, %v1092_v46  ;;  %v1275_v50 = vpack.c.bf16 %v1117_v47, %v1117_v47 }
 0x17c   : > { %v1286_v54 = vsel %vm1281_vm4, %v1274_v49, 0  ;;  %v1305_v55 = vsel %vm1281_vm4, %v1275_v50, 0 }
 0x17d   : > { %1295 = vmatpush.bf16.xpose.msrb.mxu0 %v1286_v54  ;;  %1314 = vmatpush.bf16.xpose.msrb.mxu1 %v1305_v55 }
 0x17e   : > { %v1141_v57 = vpop.f32.mrf.mxu2  ;;  %v1166_v58 = vpop.f32.mrf.mxu3 }
 0x17f   : > { %v1142_v60 = vadd.f32 %v2459_v52, %v1141_v57  ;;  %v1167_v61 = vadd.f32 %v2460_v53, %v1166_v58  ;;  %v1093_v62 = vpop.f32.mrf.mxu0  ;;  %v1118_v63 = vpop.f32.mrf.mxu1 }
 0x181   : > { %v1276_v3 = vpack.c.bf16 %v1142_v60, %v1142_v60  ;;  %v1277_v4 = vpack.c.bf16 %v1167_v61, %v1167_v61 }
 0x183   : > { %v1324_v6 = vsel %vm1281_vm4, %v1276_v3, 0  ;;  %v1343_v7 = vsel %vm1281_vm4, %v1277_v4, 0 }
 0x184   : > { %1333 = vmatpush.bf16.xpose.msrb.mxu2 %v1324_v6  ;;  %1352 = vmatpush.bf16.xpose.msrb.mxu3 %v1343_v7 }
 0x185   : > { %2258 = vmatmul.msk.bf16.vlgmr.msrb.gmra.mxu0 %vm1281_vm4, %v1270_v5  ;;  %2259 = vmatmul.msk.bf16.vlgmr.msrb.gmra.mxu1 %vm1281_vm4, %v1271_v0 }
 0x186   : > { %v1143_v10 = vpop.f32.mrf.mxu2  ;;  %v1168_v11 = vpop.f32.mrf.mxu3 }
 0x187   : > { %v1191_v17 = vpop.f32.mrf.mxu0  ;;  %v1216_v18 = vpop.f32.mrf.mxu1 }
 0x188   : > { %v1192_v19 = vadd.f32 %v2461_v15, %v1191_v17  ;;  %v1217_v20 = vadd.f32 %v2462_v16, %v1216_v18 }
 0x18a   : > { %v1474_v22 = vpack.c.bf16 %v1192_v19, %v1192_v19  ;;  %v1475_v23 = vpack.c.bf16 %v1217_v20, %v1217_v20 }
 0x18b   : > { %2260 = vmatmul.msk.bf16.vlgmr.msrb.gmra.mxu2 %vm1281_vm4, %v1272_v12  ;;  %2261 = vmatmul.msk.bf16.vlgmr.msrb.gmra.mxu3 %vm1281_vm4, %v1273_v13 }
 0x18c   : > { %v1483_v25 = vsel %vm1481_vm5, %v1474_v22, 0  ;;  %v1502_v26 = vsel %vm1481_vm5, %v1475_v23, 0  ;;  %v2650_v23 = vmov 4.0  }
 0x18d   : > { %1492 = vmatpush.bf16.msra.mxu0 %v1483_v25  ;;  %1511 = vmatpush.bf16.msra.mxu1 %v1502_v26 }
 0x18e   : > { %v1241_v24 = vpop.f32.mrf.mxu2  ;;  %v1266_v33 = vpop.f32.mrf.mxu3 }
 0x18f   : > { %v1242_v27 = vadd.f32 %v2463_v21, %v1241_v24  ;;  %v1193_v29 = vpop.f32.mrf.mxu0  ;;  %v1218_v30 = vpop.f32.mrf.mxu1  ;;  %v1267_v35 = vadd.f32 %v2464_v32, %v1266_v33 }
 0x191   : > { %v1476_v28 = vpack.c.bf16 %v1242_v27, %v1242_v27  ;;  %v1477_v36 = vpack.c.bf16 %v1267_v35, %v1267_v35 }
 0x193   : > { %v1521_v31 = vsel %vm1481_vm5, %v1476_v28, 0  ;;  %v1540_v37 = vsel %vm1481_vm5, %v1477_v36, 0 }
 0x194   : > { %1530 = vmatpush.bf16.msra.mxu2 %v1521_v31  ;;  %1549 = vmatpush.bf16.msra.mxu3 %v1540_v37 }
 0x196   : > { %v1243_v34 = vpop.f32.mrf.mxu2  ;;  %v1268_v38 = vpop.f32.mrf.mxu3 }
 0x202   : > { %v1297_v40 = vpop.f32.mrf.mxu0  ;;  %v1316_v41 = vpop.f32.mrf.mxu1 }
 0x203   : > { %v1298_v42 = vadd.f32 %v2465_v39, %v1297_v40  ;;  %v1317_v44 = vadd.f32 %v2465_v39, %v1316_v41 }
 0x205   : > { %v1358_v43 = vsel %vm1281_vm4, %v1298_v42, -inf  ;;  %v1361_v47 = vsel %vm1281_vm4, %v1317_v44, -inf }
 0x206   : > { %1359 = vmax.xlane.f32.xlu1 %v1358_v43 }
 0x20a   : > { %v1299_v45 = vpop.f32.mrf.mxu0  ;;  %v1318_v46 = vpop.f32.mrf.mxu1 }
 0x20e   : > { %v1335_v48 = vpop.f32.mrf.mxu2  ;;  %v1354_v49 = vpop.f32.mrf.mxu3  ;;  %1362 = vmax.xlane.f32.xlu1 %v1361_v47 }
 0x20f   : > { %v1336_v50 = vadd.f32 %v2465_v39, %v1335_v48  ;;  %v1355_v52 = vadd.f32 %v2465_v39, %v1354_v49 }
 0x211   : > { %v1364_v51 = vsel %vm1281_vm4, %v1336_v50, -inf  ;;  %v1367_v55 = vsel %vm1281_vm4, %v1355_v52, -inf }
 0x212   : > { %1365 = vmax.xlane.f32.xlu0 %v1364_v51 }
 0x216   : > { %v1337_v53 = vpop.f32.mrf.mxu2  ;;  %v1356_v54 = vpop.f32.mrf.mxu3 }
 0x21a   : > { %1368 = vmax.xlane.f32.xlu0 %v1367_v55 }
 0x279   : > { %v1360_v56 = vpop.xlane.xlu1 %1359 }
 0x27a   : > { %v1370_v57 = vsub.f32 %v1298_v42, %v1360_v56 }
 0x27c   : > { %v1374_v58 = vmul.f32 1.442695, %v1370_v57 }
 0x27e   : > { %2473 = vpow2.f32 %v1374_v58 }
 0x281   : > { %v1363_v59 = vpop.xlane.xlu1 %1362 }
 0x282   : > { %v1371_v60 = vsub.f32 %v1317_v44, %v1363_v59 }
 0x284   : > { %v2474_v61 = vpop.eup %2473  ;;  %v1376_v62 = vmul.f32 1.442695, %v1371_v60 }
 0x285   : > { %v1366_v63 = vpop.xlane.xlu0 %1365  ;;  %v1382_v0 = vsel %vm1281_vm4, %v2474_v61, 0.0 }
 0x286   : > { %2475 = vpow2.f32 %v1376_v62  ;;  %v1372_v1 = vsub.f32 %v1336_v50, %v1366_v63  ;;  %1383 = vadd.xlane.f32.xlu0 %v1382_v0 }
 0x288   : > { %v1378_v2 = vmul.f32 1.442695, %v1372_v1 }
 0x28a   : > { %2477 = vpow2.f32 %v1378_v2 }
 0x28c   : > { %v3036_v3 = vpop.eup %2475 }
 0x28d   : > { %v1369_v4 = vpop.xlane.xlu0 %1368  ;;  %v1385_v5 = vsel %vm1281_vm4, %v3036_v3, 0.0 }
 0x28e   : > { %v1373_v6 = vsub.f32 %v1355_v52, %v1369_v4  ;;  %1386 = vadd.xlane.f32.xlu1 %v1385_v5 }
 0x290   : > { %v3040_v7 = vpop.eup %2477  ;;  %v1380_v8 = vmul.f32 1.442695, %v1373_v6 }
 0x291   : > { %v1388_v9 = vsel %vm1281_vm4, %v3040_v7, 0.0 }
 0x292   : > { %2479 = vpow2.f32 %v1380_v8  ;;  %1389 = vadd.xlane.f32.xlu2 %v1388_v9 }
 0x298   : > { %v3044_v10 = vpop.eup %2479 }
 0x299   : > { %v1391_v11 = vsel %vm1281_vm4, %v3044_v10, 0.0 }
 0x29a   : > { %1392 = vadd.xlane.f32.xlu2 %v1391_v11 }
 0x2f9   : > { %v1384_v12 = vpop.xlane.xlu0 %1383 }
 0x2fa   : > { %2481 = vrcp.f32 %v1384_v12  ;;  %v1405_v18 = vand.u32 2147483648, %v1384_v12  ;;  %v1403_v20 = vand.u32 2147483647, %v1384_v12  ;;  %vm1399_vm7 = vweird.f32 %v1384_v12 }
 0x2fc   : > { %v1406_v25 = vor.u32 1.1754944e-38, %v1405_v18  ;;  %vm1404_vm9 = vcmp.eq.f32.partialorder %v1403_v20, 8.507059e+37  ;;  %v1559_v18 = vld [vmem:[%s2907_s29] sm:$0xf]  ;;  %v1560_v20 = vld [vmem:[%s2907_s29 + $0x4] sm:$0xf] }
 0x300   : > { %v2482_v13 = vpop.eup %2481 }
 0x301   : > { %v1395_v15 = vmul.f32 %v2482_v13, %v1384_v12  ;;  %v1387_v16 = vpop.xlane.xlu1 %1386  ;;  %vm1400_vm6 = vweird.f32 %v2482_v13 }
 0x302   : > { %2483 = vrcp.f32 %v1387_v16  ;;  %vm1401_vm8 = vmor %vm1399_vm7, %vm1400_vm6  ;;  %v1418_v32 = vand.u32 2147483647, %v1387_v16  ;;  %v1420_v33 = vand.u32 2147483648, %v1387_v16  ;;  %vm1414_vm11 = vweird.f32 %v1387_v16 }
 0x303   : > { %v1396_v17 = vsub.f32 1.0, %v1395_v15 }
 0x304   : > { %vm1419_vm13 = vcmp.eq.f32.partialorder %v1418_v32, 8.507059e+37  ;;  %v1421_v41 = vor.u32 1.1754944e-38, %v1420_v33 }
 0x305   : > { %v1397_v19 = vmul.f32 %v2482_v13, %v1396_v17  ;;  %v1390_v21 = vpop.xlane.xlu2 %1389 }
 0x306   : > { %2485 = vrcp.f32 %v1390_v21  ;;  %v1435_v42 = vand.u32 2147483648, %v1390_v21  ;;  %v1433_v46 = vand.u32 2147483647, %v1390_v21  ;;  %vm1429_vm15 = vweird.f32 %v1390_v21 }
 0x307   : > { %v1398_v22 = vadd.f32 %v2482_v13, %v1397_v19  ;;  %2487 = vrcp.f32 %v2650_v23  ;;  %v1567_v19 = vsel %vm1481_vm5, %v1559_v18, 0  ;;  %v1562_v23 = vld [vmem:[%s2907_s29 + $0xc] sm:$0xf]  ;;  %v2467_v18 = vld [vmem:[%s3322_s14] ss:$0 sm:$0xff]  ;;  %s3329_s14 = sld [smem:[#allocation42_spill]] (!%p2296_p8) }
 0x308   : > { %v2484_v24 = vpop.eup %2483  ;;  %v1436_v51 = vor.u32 1.1754944e-38, %v1435_v42  ;;  %vm1434_vm1 = vcmp.eq.f32.partialorder %v1433_v46, 8.507059e+37  ;;  %1576 = vmatpush.bf16.msrb.mxu0 %v1567_v19 }
 0x309   : > { %v1402_v26 = vsel %vm1401_vm8, %v2482_v13, %v1398_v22  ;;  %v1410_v27 = vmul.f32 %v2484_v24, %v1387_v16  ;;  %vm1415_vm10 = vweird.f32 %v2484_v24 }
 0x30a   : > { %v1407_v28 = vsel %vm1404_vm9, %v1406_v25, %v1402_v26  ;;  %vm1416_vm12 = vmor %vm1414_vm11, %vm1415_vm10 }
 0x30b   : > { %v1408_v29 = vmul.f32 %v2474_v61, %v1407_v28  ;;  %v1411_v30 = vsub.f32 1.0, %v1410_v27 }
 0x30c   : > { %v2486_v31 = vpop.eup %2485 }
 0x30d   : > { %v2488_v34 = vpop.eup %2487  ;;  %v1412_v35 = vmul.f32 %v2484_v24, %v1411_v30  ;;  %v1425_v36 = vmul.f32 %v2486_v31, %v1390_v21  ;;  %v1393_v37 = vpop.xlane.xlu2 %1392  ;;  %v1470_v40 = vpack.c.bf16 %v1408_v29, %v1408_v29  ;;  %vm1430_vm14 = vweird.f32 %v2486_v31  ;;  %v1561_v21 = vld [vmem:[%s2907_s29 + $0x8] sm:$0xf] }
 0x30e   : > { %2489 = vrcp.f32 %v1393_v37  ;;  %v1462_v43 = vmul.f32 4.0, %v2488_v34  ;;  %vm1431_vm0 = vmor %vm1429_vm15, %vm1430_vm14  ;;  %v1450_v60 = vand.u32 2147483648, %v1393_v37  ;;  %v1448_v62 = vand.u32 2147483647, %v1393_v37 }
 0x30f   : > { %v1413_v38 = vadd.f32 %v2484_v24, %v1412_v35  ;;  %v1426_v39 = vsub.f32 1.0, %v1425_v36  ;;  %2262 = vmatmul.msk.bf16.vlgmr.msra.gmra.mxu0 %vm1281_vm4, %v1470_v40  ;;  %vm1444_vm6 = vweird.f32 %v1393_v37  ;;  %v1454_v4 = vsel %vm1281_vm4, %v1408_v29, 0.0 }
 0x310   : > { %v1463_v52 = vsub.f32 1.0, %v1462_v43  ;;  %vm1449_vm8 = vcmp.eq.f32.partialorder %v1448_v62, 8.507059e+37  ;;  %vm1466_vm9 = vweird.f32 %v2488_v34  ;;  %v1605_v22 = vsel %vm1481_vm5, %v1561_v21, 0 }
 0x311   : > { %v1417_v44 = vsel %vm1416_vm12, %v2484_v24, %v1413_v38  ;;  %v1427_v45 = vmul.f32 %v2486_v31, %v1426_v39  ;;  %1614 = vmatpush.bf16.msrb.mxu2 %v1605_v22  ;;  %v1624_v24 = vsel %vm1481_vm5, %v1562_v23, 0  ;;  %vm1766_vm12 = vcmask 523264  }
 0x312   : > { %v1422_v47 = vsel %vm1419_vm13, %v1421_v41, %v1417_v44  ;;  %v1464_v59 = vmul.f32 %v2488_v34, %v1463_v52  ;;  %1633 = vmatpush.bf16.msrb.mxu3 %v1624_v24  ;;  %v2343_v24 = vld [vmem:[%s2943_s8 + $0x8] sm:$0xff] }
 0x313   : > { %v1423_v48 = vmul.f32 %v3036_v3, %v1422_v47  ;;  %v1428_v49 = vadd.f32 %v2486_v31, %v1427_v45  ;;  %v1451_v3 = vor.u32 1.1754944e-38, %v1450_v60 }
 0x314   : > { %v2490_v50 = vpop.eup %2489  ;;  %v1465_v2 = vadd.f32 %v2488_v34, %v1464_v59 }
 0x315   : > { %v1432_v53 = vsel %vm1431_vm0, %v2486_v31, %v1428_v49  ;;  %v1440_v54 = vmul.f32 %v2490_v50, %v1393_v37  ;;  %v1471_v56 = vpack.c.bf16 %v1423_v48, %v1423_v48  ;;  %vm1445_vm2 = vweird.f32 %v2490_v50  ;;  %v2466_v49 = vld [vmem:[%s3320_s21] ss:$0 sm:$0xff] }
 0x316   : > { %v1437_v55 = vsel %vm1434_vm1, %v1436_v51, %v1432_v53  ;;  %v1455_v0 = vsel %vm1281_vm4, %v1423_v48, 0.0  ;;  %vm1446_vm7 = vmor %vm1444_vm6, %vm1445_vm2  ;;  %v1467_v12 = vsel %vm1466_vm9, %v2488_v34, %v1465_v2 }
 0x317   : > { %v1438_v57 = vmul.f32 %v3040_v7, %v1437_v55  ;;  %v1441_v58 = vsub.f32 1.0, %v1440_v54  ;;  %2263 = vmatmul.msk.bf16.vlgmr.msra.gmra.mxu1 %vm1281_vm4, %v1471_v56  ;;  %v1456_v7 = vadd.f32 %v1455_v0, %v1454_v4  ;;  %v2651_v56 = vmov 32.0   ;;  %v2340_v4 = vld [vmem:[%s2929_s6] sm:$0xff] }
 0x318   : > { %2491 = vrcp.f32 %v2651_v56 }
 0x319   : > { %v1442_v61 = vmul.f32 %v2490_v50, %v1441_v58  ;;  %v1472_v63 = vpack.c.bf16 %v1438_v57, %v1438_v57  ;;  %v1457_v5 = vsel %vm1281_vm4, %v1438_v57, 0.0 }
 0x31a   : > { %v1458_v11 = vadd.f32 %v1457_v5, %v1456_v7  ;;  %v2345_v5 = vld [vmem:[%s2943_s8 + $0x18] sm:$0xff] }
 0x31b   : > { %v1443_v1 = vadd.f32 %v2490_v50, %v1442_v61  ;;  %2264 = vmatmul.msk.bf16.vlgmr.msra.gmra.mxu2 %vm1281_vm4, %v1472_v63 }
 0x31d   : > { %v1447_v6 = vsel %vm1446_vm7, %v2490_v50, %v1443_v1 }
 0x31e   : > { %v1452_v8 = vsel %vm1449_vm8, %v1451_v3, %v1447_v6  ;;  %v2492_v57 = vpop.eup %2491  ;;  %v2341_v3 = vld [vmem:[%s2929_s6 + $0x8] sm:$0xff] }
 0x31f   : > { %v1453_v9 = vmul.f32 %v3044_v10, %v1452_v8  ;;  %v1586_v10 = vsel %vm1481_vm5, %v1560_v20, 0  ;;  %v1658_v58 = vmul.f32 32.0, %v2492_v57  ;;  %1721 = vmatpush.bf16.msra.mxu0 %v2341_v3  ;;  %v2344_v8 = vld [vmem:[%s2943_s8 + $0x10] sm:$0xff]  ;;  %v2468_v20 = vld [vmem:[%s3324_s4] ss:$0 sm:$0xff] }
 0x320   : > { %1595 = vmatpush.bf16.msrb.mxu1 %v1586_v10 }
 0x321   : > { %v1459_v13 = vsel %vm1281_vm4, %v1453_v9, 0.0  ;;  %v1473_v15 = vpack.c.bf16 %v1453_v9, %v1453_v9  ;;  %v1659_v59 = vsub.f32 1.0, %v1658_v58 }
 0x322   : > { %v1460_v16 = vadd.f32 %v1459_v13, %v1458_v11 }
 0x323   : > { %2265 = vmatmul.msk.bf16.vlgmr.msra.gmra.mxu3 %vm1281_vm4, %v1473_v15  ;;  %v1660_v60 = vmul.f32 %v2492_v57, %v1659_v59  ;;  %1722 = vmatpush.bf16.msra.mxu0 %v2340_v4 }
 0x324   : > { %v1468_v17 = vmul.f32 %v1467_v12, %v1460_v16  ;;  %1774 = vmatpush.bf16.msra.mxu1 %v2345_v5 }
 0x325   : > { %v1661_v61 = vadd.f32 %v2492_v57, %v1660_v60 }
 0x326   : > { %1469 = vst.msk [vmem:[%s779_s0] sm:$0xff] %vm1281_vm4, %v1468_v17 }
 0x328   : > { %1775 = vmatpush.bf16.msra.mxu1 %v2344_v8 }
 0x32c   : > { %1776 = vmatpush.bf16.msra.mxu1 %v2343_v24 }
 0x38c   : > { %v1494_v25 = vpop.f32.mrf.mxu0 }
 0x38d   : > { %v1555_v26 = vpack.c.bf16 %v1494_v25, %v1494_v25  ;;  %v2342_v25 = vld [vmem:[%s2943_s8] sm:$0xff] }
 0x38e   : > { %1777 = vmatpush.bf16.msra.mxu1 %v2342_v25 }
 0x38f   : > { %2266 = vmatmul.msk.bf16.vlgmr.msrb.gmra.mxu0 %vm1281_vm4, %v1555_v26  ;;  %v2469_v26 = vld [vmem:[%s817_s22] ss:$0 sm:$0xff] }
 0x394   : > { %v1513_v27 = vpop.f32.mrf.mxu1  ;;  %v1496_v28 = vpop.f32.mrf.mxu0 }
 0x395   : > { %v1556_v29 = vpack.c.bf16 %v1513_v27, %v1513_v27 }
 0x397   : > { %2267 = vmatmul.msk.bf16.vlgmr.msrb.gmra.mxu1 %vm1281_vm4, %v1556_v29 }
 0x39c   : > { %v1515_v30 = vpop.f32.mrf.mxu1 }
 0x39e   : > { %v1532_v31 = vpop.f32.mrf.mxu2 }
 0x39f   : > { %v1557_v32 = vpack.c.bf16 %v1532_v31, %v1532_v31 }
 0x3a1   : > { %2268 = vmatmul.msk.bf16.vlgmr.msrb.gmra.mxu2 %vm1281_vm4, %v1557_v32  ;;  %v2470_v32 = vld [vmem:[%s3325_s20] ss:$0 sm:$0xff] }
 0x3a6   : > { %v1534_v33 = vpop.f32.mrf.mxu2  ;;  %v1551_v34 = vpop.f32.mrf.mxu3 }
 0x3a7   : > { %v1558_v35 = vpack.c.bf16 %v1551_v34, %v1551_v34 }
 0x3a9   : > { %2269 = vmatmul.msk.bf16.vlgmr.msrb.gmra.mxu3 %vm1281_vm4, %v1558_v35  ;;  %vm1662_vm4 = vweird.f32 %v2492_v57 }
 0x3aa   : > { %v1663_v62 = vsel %vm1662_vm4, %v2492_v57, %v1661_v61 }
 0x3ae   : > { %v1553_v36 = vpop.f32.mrf.mxu3 }
 0x40c   : > { %v1578_v37 = vpop.f32.mrf.mxu0 }
 0x40d   : > { %v1639_v43 = vsel %vm978_vm3, %v1578_v37, 0.0 }
 0x414   : > { %v1597_v38 = vpop.f32.mrf.mxu1  ;;  %v1580_v39 = vpop.f32.mrf.mxu0 }
 0x415   : > { %v1640_v42 = vsel %vm978_vm3, %v1597_v38, 0.0 }
 0x416   : > { %v1641_v45 = vadd.f32 %v1640_v42, %v1639_v43 }
 0x41c   : > { %v1599_v40 = vpop.f32.mrf.mxu1 }
 0x424   : > { %v1616_v41 = vpop.f32.mrf.mxu2 }
 0x425   : > { %v1642_v44 = vsel %vm978_vm3, %v1616_v41, 0.0 }
 0x426   : > { %v1643_v46 = vadd.f32 %v1642_v44, %v1641_v45 }
 0x42c   : > { %v1618_v47 = vpop.f32.mrf.mxu2  ;;  %v1635_v48 = vpop.f32.mrf.mxu3 }
 0x42d   : > { %v1644_v50 = vsel %vm978_vm3, %v1635_v48, 0.0 }
 0x42e   : > { %v1645_v51 = vadd.f32 %v1644_v50, %v1643_v46 }
 0x430   : > { %v1650_v52 = vadd.f32 %v2466_v49, %v1645_v51 }
 0x432   : > { %v1651_v53 = vadd.f32 %v1650_v52, %v2968_v14  ;;  %v2471_v52 = vld [vmem:[%s828_s1] ss:$0 sm:$0xff] }
 0x434   : > { %v1637_v54 = vpop.f32.mrf.mxu3  ;;  %v1654_v55 = vsel %vm978_vm3, %v1651_v53, 0.0 }
 0x435   : > { %1655 = vadd.xlane.f32.xlu2 %v1654_v55  ;;  %v2472_v54 = vld [vmem:[%s831_s9] ss:$0 sm:$0xff] }
 0x4a8   : > { %v1656_v63 = vpop.xlane.xlu2 %1655 }
 0x4a9   : > { %v1664_v0 = vmul.f32 %v1663_v62, %v1656_v63 }
 0x4ab   : > { %v1665_v14 = vsub.f32 %v1651_v53, %v1664_v0 }
 0x4ad   : > { %v1666_v1 = vmul.f32 %v1665_v14, %v1665_v14 }
 0x4af   : > { %v1667_v2 = vsel %vm978_vm3, %v1666_v1, 0.0 }
 0x4b0   : > { %1668 = vadd.xlane.f32.xlu0 %v1667_v2 }
 0x523   : > { %v1669_v6 = vpop.xlane.xlu0 %1668 }
 0x524   : > { %v1670_v7 = vmul.f32 %v1669_v6, %v1663_v62 }
 0x526   : > { %v1671_v9 = vadd.f32 1e-05, %v1670_v7 }
 0x528   : > { %2493 = vrsqrt.f32 %v1671_v9  ;;  %vm1678_vm10 = vweird.f32 %v1671_v9 }
 0x52e   : > { %v2494_v11 = vpop.eup %2493 }
 0x52f   : > { %v1673_v12 = vmul.f32 %v2494_v11, %v1671_v9  ;;  %vm1679_vm5 = vweird.f32 %v2494_v11 }
 0x530   : > { %vm1680_vm11 = vmor %vm1678_vm10, %vm1679_vm5 }
 0x531   : > { %v1674_v13 = vmul.f32 %v2494_v11, %v1673_v12 }
 0x533   : > { %v1675_v15 = vmul.f32 0.5, %v1674_v13 }
 0x535   : > { %v1676_v16 = vsub.f32 1.5, %v1675_v15 }
 0x537   : > { %v1677_v17 = vmul.f32 %v2494_v11, %v1676_v16 }
 0x539   : > { %v1681_v19 = vsel %vm1680_vm11, %v2494_v11, %v1677_v17 }
 0x53a   : > { %v1682_v10 = vmul.f32 %v1681_v19, %v1665_v14 }
 0x53c   : > { %v1686_v21 = vmul.f32 %v2467_v18, %v1682_v10 }
 0x53e   : > { %v1690_v22 = vadd.f32 %v2468_v20, %v1686_v21 }
 0x540   : > { %v1696_v23 = vpack.c.bf16 %v1690_v22, %v1690_v22 }
 0x542   : > { %2278 = vmatmul.msk.bf16.vlgmr.msra.gmra.mxu0 %vm978_vm3, %v1696_v23 }
 0x5bf   : > { %v1724_v27 = vpop.f32.mrf.mxu0 }
 0x5c0   : > { %v1725_v28 = vadd.f32 %v2469_v26, %v1724_v27 }
 0x5c2   : > { %v1728_v29 = vmax.f32 %v1725_v28, 0.0 }
 0x5c4   : > { %v1738_v30 = vpack.c.bf16 %v1728_v29, %v1728_v29 }
 0x5c6   : > { %2295 = vmatmul.msk.bf16.vlgmr.msra.gmra.mxu1 %vm1766_vm12, %v1738_v30 }
 0x5c7   : > { %v1726_v31 = vpop.f32.mrf.mxu0 }
 0x643   : > { %v1779_v33 = vpop.f32.mrf.mxu1 }
 0x644   : > { %v1780_v34 = vadd.f32 %v2470_v32, %v1779_v33 }
 0x646   : > { %v1783_v35 = vadd.f32 %v1780_v34, %v1690_v22 }
 0x648   : > { %v1786_v36 = vsel %vm978_vm3, %v1783_v35, 0.0 }
 0x649   : > { %1787 = vadd.xlane.f32.xlu1 %v1786_v36 }
 0x64b   : > { %v1781_v37 = vpop.f32.mrf.mxu1 }
 0x6bc   : > { %v1788_v38 = vpop.xlane.xlu1 %1787 }
 0x6bd   : > { %v1789_v39 = vmul.f32 %v1788_v38, %v1663_v62 }
 0x6bf   : > { %v1790_v40 = vsub.f32 %v1783_v35, %v1789_v39 }
 0x6c1   : > { %v1791_v41 = vmul.f32 %v1790_v40, %v1790_v40 }
 0x6c3   : > { %v1792_v42 = vsel %vm978_vm3, %v1791_v41, 0.0 }
 0x6c4   : > { %1793 = vadd.xlane.f32.xlu2 %v1792_v42 }
 0x737   : > { %v1794_v43 = vpop.xlane.xlu2 %1793 }
 0x738   : > { %v1795_v44 = vmul.f32 %v1794_v43, %v1663_v62 }
 0x73a   : > { %v1796_v45 = vadd.f32 1e-05, %v1795_v44 }
 0x73c   : > { %2495 = vrsqrt.f32 %v1796_v45  ;;  %vm1803_vm14 = vweird.f32 %v1796_v45 }
 0x742   : > { %v2496_v46 = vpop.eup %2495 }
 0x743   : > { %v1798_v47 = vmul.f32 %v2496_v46, %v1796_v45  ;;  %vm1804_vm13 = vweird.f32 %v2496_v46 }
 0x744   : > { %vm1805_vm15 = vmor %vm1803_vm14, %vm1804_vm13 }
 0x745   : > { %v1799_v48 = vmul.f32 %v2496_v46, %v1798_v47 }
 0x747   : > { %v1800_v49 = vmul.f32 0.5, %v1799_v48 }
 0x749   : > { %v1801_v50 = vsub.f32 1.5, %v1800_v49 }
 0x74b   : > { %v1802_v51 = vmul.f32 %v2496_v46, %v1801_v50 }
 0x74d   : > { %v1806_v53 = vsel %vm1805_vm15, %v2496_v46, %v1802_v51 }
 0x74e   : > { %v1807_v55 = vmul.f32 %v1806_v53, %v1790_v40 }
 0x750   : > { %v1811_v56 = vmul.f32 %v2471_v52, %v1807_v55  ;;  %1820 = sbr.rel (%p2296_p8) target bundleno = 2019 (0x7e3), region = 100 }
 0x752   : > { %v1815_v57 = vadd.f32 %v2472_v54, %v1811_v56 }
 0x754   : > { %1816 = vst.msk [vmem:[#allocation2] sm:$0xff] %vm978_vm3, %v1815_v57 }
 0x755   : > { %v2347_v58 = vld [vmem:[%s3328_s12 + $0x8] sm:$0xff]  ;;  %v2346_v59 = vld [vmem:[%s3328_s12] sm:$0xff]  ;;  %v1826_v60 = vpack.c.bf16 %v1815_v57, %v1815_v57 }
 0x756   : > { %1851 = vmatpush.bf16.msra.mxu0 %v2347_v58  ;;  %v2497_v61 = vld [vmem:[%s3329_s14] ss:$0 sm:$0xff] }
 0x75a   : > { %1852 = vmatpush.bf16.msra.mxu0 %v2346_v59 }
 0x75d   : > { %2305 = vmatmul.msk.bf16.vlgmr.msra.gmra.mxu0 %vm978_vm3, %v1826_v60 }
 0x7da   : > { %v1854_v62 = vpop.f32.mrf.mxu0 }
 0x7db   : > { %v1855_v63 = vadd.f32 %v2497_v61, %v1854_v62 }
 0x7dd   : > { %1858 = vst [vmem:[%s772_s16] sm:$0xff] %v1855_v63 }
 0x7e2   : > { %v1856_v0 = vpop.f32.mrf.mxu0 }
 0x7e3 PF: > { %s3330_s23 = sld [smem:[#allocation15_spill]]  ;;  %s1877_s20 = sshll.u32 %s772_s16, 4  ;;  %s1878_s20 = int_to_ptr.vmem [resolvable:$true] %s1877_s20 }
 0x7e4   : > { %s3331_s28 = sld [smem:[#allocation13_spill]] }
 0x7e5   : > { %s3333_s10 = sld [smem:[#allocation43_spill]] }
 0x7e9   : > { %s2308_s4 = sshll.u32 %s3330_s23, 3 }
 0x7ea   : > { %s3334_s22 = sand.u32 1, %s3331_s28  }
 0x7eb   : > { %s1875_s30 = scalar_lea.hbm %s3333_s10, %s2308_s4  ;;  %s1860_s27 = scalar_lea.sflag [#allocation4], %s3334_s22 }
 0x7ec   : > { %s1879_s8 = sshll.u32 %s1875_s30, 4  ;;  %s2518_s6 = scalar_lea.hbm %s3333_s10, 16  ;;  %s1880_s8 = int_to_ptr.hbm [resolvable:$true] %s1879_s8 }
 0x7ed   : > { %s2512_s25 = sshra.s32 %s1880_s8, 4  ;;  %s2513_s25 = int_to_ptr.hbm [resolvable:$true] %s2512_s25 }
 0x7ee   : > { %s2514_s29 = scalar_lea.hbm %s2513_s25, 8  ;;  %p2519_p0 = scmp.lt.s32.totalorder %s2513_s25, %s3333_s10 }
 0x7ef   : > { %p2515_p9 = scmp.ne.s32.totalorder %s2513_s25, %s2514_s29  ;;  %p2520_p1 = scmp.lt.s32.totalorder %s2518_s6, %s2514_s29 }
 0x7f1   : > { %p2516_p10 = pnand %p2515_p9, %p2823_p3  ;;  %p2521_p4 = por %p2520_p1, %p2519_p0 }
 0x7f3   : > { %p2517_p11 = pneg %p2516_p10 }
 0x7f5   : > { %p2522_p2 = pnand %p2521_p4, %p2517_p11 }
 0x7f7   : > { %2525 = shalt.err (!%p2522_p2)
}
 0x7f8   : > { %s3335_s18 = sld [smem:[#allocation10_spill]]  ;;  %s2309_s9 = sshll.u32 %s2632_s2, 1 }
 0x7f9   : > { %2350 = dma.vmem_to_hbm [thread:$0]  (%p2823_p3), %s1878_s20, 128, %s1880_s8, %s1860_s27  }
 0x7fa   : > { %s1893_s26 = sshll.u32 %s779_s0, 4  ;;  %s1889_s14 = sadd.s32 %s3330_s23, %s2309_s9  ;;  %s1894_s26 = int_to_ptr.vmem [resolvable:$true] %s1893_s26 }
 0x7fb   : > { %s2310_s28 = sshll.u32 %s1889_s14, 3  ;;  %s3337_s17 = sld [smem:[#allocation44_spill]] }
 0x7fe   : > { %s3338_s25 = sand.u32 1, %s3335_s18  }
 0x7ff   : > { %s1865_s15 = scalar_lea.sflag [#allocation6], %s3338_s25 }
 0x801   : > { %s1891_s30 = scalar_lea.hbm %s3337_s17, %s2310_s28  ;;  %s2546_s0 = scalar_lea.hbm %s3337_s17, 32 }
 0x802   : > { %s1895_s22 = sshll.u32 %s1891_s30, 4  ;;  %s1896_s22 = int_to_ptr.hbm [resolvable:$true] %s1895_s22 }
 0x803   : > { %s2540_s29 = sshra.s32 %s1896_s22, 4  ;;  %s2541_s29 = int_to_ptr.hbm [resolvable:$true] %s2540_s29 }
 0x804   : > { %s2542_s24 = scalar_lea.hbm %s2541_s29, 8  ;;  %p2547_p8 = scmp.lt.s32.totalorder %s2541_s29, %s3337_s17 }
 0x805   : > { %p2543_p5 = scmp.ne.s32.totalorder %s2541_s29, %s2542_s24  ;;  %p2548_p9 = scmp.lt.s32.totalorder %s2546_s0, %s2542_s24 }
 0x807   : > { %p2544_p3 = pnand %p2543_p5, %p2852_p12  ;;  %p2549_p10 = por %p2548_p9, %p2547_p8 }
 0x809   : > { %p2545_p6 = pneg %p2544_p3 }
 0x80b   : > { %p2550_p11 = pnand %p2549_p10, %p2545_p6 }
 0x80d   : > { %2553 = shalt.err (!%p2550_p11)
}
 0x80e   : > { %2351 = dma.vmem_to_hbm [thread:$0]  (%p2852_p12), %s1894_s26, 128, %s1896_s22, %s1865_s15  }
 0x80f PF: > { %s3339_s8 = sld [smem:[#allocation18_spill]] }
 0x810   : > { %s3340_s27 = sld [smem:[#allocation12_spill]] }
 0x815   : > { %p2361_p0 = scmp.ge.s32.totalorder %s3339_s8, 2 }
 0x816   : > { %s1907_s6 = sand.u32 1, %s3340_s27  }
 0x817   : > { %p2355_p1 = pnand %p2361_p0, %p2840_p7  ;;  %s1908_s1 = scalar_lea.sflag [#allocation4], %s1907_s6 }
 0x819   : > { %p2356_p4 = pneg %p2355_p1 }
 0x81b   : > { %2599 = dma.done.wait (%p2356_p4), %s1908_s1, 128  }
 0x81c   : > { %2601 = vsyncadd (%p2356_p4), %s1908_s1, 4294967168  ;;  %s3342_s3 = sld [smem:[#allocation9_spill]]  ;;  %p2358_p2 = pnand %p2361_p0, %p2864_p13 }
 0x81e   : > { %p2359_p5 = pneg %p2358_p2 }
 0x822   : > { %s1917_s9 = sand.u32 1, %s3342_s3  }
 0x823   : > { %s1918_s16 = scalar_lea.sflag [#allocation6], %s1917_s9 }
 0x824   : > { %2603 = dma.done.wait (%p2359_p5), %s1918_s16, 128  }
 0x825   : > { %2605 = vsyncadd (%p2359_p5), %s1918_s16, 4294967168  ;;  %s36_s3 = sadd.s32 1, %s3339_s8   ;;  %s3344_s0 = sld [smem:[#allocation10_spill]] }
 0x826   : > { %p33_p12 = scmp.ge.s32.totalorder %s36_s3, 6   ;;  %s3345_s30 = sld [smem:[#allocation11_spill]] }
 0x827   : > { %s3346_s20 = sld [smem:[#allocation25_spill]] }
 0x828   : > { %s3347_s21 = sld [smem:[#allocation13_spill]] }
 0x829   : > { %s3348_s1 = sld [smem:[#allocation14_spill]] }
 0x82a   : > { %s3349_s22 = sld [smem:[#allocation24_spill]]  ;;  %35 = sbr.rel (!%p33_p12) target bundleno = 27 (0x1b), region = 191 }
 0x82b   : > { %s3350_s2 = sld [smem:[#allocation16_spill]] }
 0x82c   : > { %s3351_s23 = sld [smem:[#allocation17_spill]] }
 0x82d   : > { %s3352_s24 = sld [smem:[#allocation19_spill]] }
 0x82e   : > { %s3353_s25 = sld [smem:[#allocation21_spill]] }
 0x82f   :  { %1924 = vsyncpa [#allocation4], 1 }
 0x830   :  { %1926 = vsyncpa [#allocation4 + $0x1], 1 }
 0x831   :  { %1927 = vsyncpa [#allocation6], 1 }
 0x832   :  { %1929 = vsyncpa [#allocation6 + $0x1], 1 }

</bundles_post_ra>
